<compile_context>
chip_gen: v7x
topology: tpu7x:2x2x1
jax: 0.10.0
libtpu: 0.0.40
codegen_flags: <defaults>
</compile_context>

<pallas_src>
import jax
import jax.numpy as jnp
from jax.experimental import pallas as pl
from jax.experimental.pallas import tpu as pltpu

_EPS = 1e-5
_LANE = 128


# ------------------------------- helpers ----------------------------------- #

def _round_up(v, m):
    return ((v + m - 1) // m) * m


def _fold_bn(gamma, beta, mean, var, eps=_EPS):
    scale = gamma / jnp.sqrt(var + eps)
    bias = beta - mean * scale
    return scale, bias


def _prep_conv3x3(w_oihw, scale, cpi, cpo):
    """(Cout,Cin,3,3) -> (9, cpi, cpo) bf16 with the BN scale folded into out-chans."""
    cout, cin, kh, kw = w_oihw.shape
    w = w_oihw * scale[:, None, None, None]
    w = jnp.transpose(w, (2, 3, 1, 0)).reshape(kh * kw, cin, cout)   # (kh*kw, Cin, Cout)
    wp = jnp.zeros((kh * kw, cpi, cpo), jnp.float32).at[:, :cin, :cout].set(w)
    return wp.astype(jnp.bfloat16)


def _pad_bias(b, cpo):
    return jnp.zeros((1, cpo), jnp.float32).at[0, : b.shape[0]].set(b)


# ----------------------------- Pallas kernel -------------------------------- #

def _make_resblock_kernel(ho, wo, s, cpi, cpo):
    """Fully fused residual block for one batch element (conv1+BN1+ReLU -> conv2+BN2
    -> +shortcut(1x1 conv or identity) -> ReLU). 3x3 convs = 9 shifted matmuls."""
    m = ho * wo

    def kernel(x_ref, w1_ref, b1_ref, w2_ref, b2_ref, ws_ref, bs_ref, o_ref, h_ref):
        # ---- conv1 (3x3, stride s) -- BN1 scale folded into w1 ----
        acc1 = jnp.zeros((m, cpo), jnp.float32)
        for kh in range(3):
            for kw in range(3):
                p = (kh % s) * s + (kw % s)          # stride phase of this tap
                oh, ow = kh // s, kw // s            # offset inside the phase
                lhs = x_ref[p, oh:oh + ho, ow:ow + wo, :].reshape(m, cpi)
                acc1 = acc1 + jnp.dot(lhs, w1_ref[kh * 3 + kw],
                                      preferred_element_type=jnp.float32)
        out1 = jnp.maximum(acc1 + b1_ref[...], 0.0)   # folded BN1 bias + ReLU

        # ---- stage out1 (zero-padded halo) in VMEM; it never touches HBM ----
        h_ref[...] = jnp.zeros_like(h_ref)
        h_ref[1:1 + ho, 1:1 + wo, :] = out1.reshape(ho, wo, cpo).astype(h_ref.dtype)

        # ---- shortcut (1x1 conv with folded BN, or padded identity) fused here ----
        psc = (1 % s) * s + (1 % s)                  # phase/offset of x[ho*s, wo*s]
        osc = 1 // s
        xs = x_ref[psc, osc:osc + ho, osc:osc + wo, :].reshape(m, cpi)
        acc2 = jnp.dot(xs, ws_ref[...], preferred_element_type=jnp.float32)
        acc2 = acc2 + bs_ref[...] + b2_ref[...]

        # ---- conv2 (3x3, stride 1) -- BN2 scale folded into w2 ----
        for kh in range(3):
            for kw in range(3):
                lhs = h_ref[kh:kh + ho, kw:kw + wo, :].reshape(m, cpo)
                acc2 = acc2 + jnp.dot(lhs, w2_ref[kh * 3 + kw],
                                      preferred_element_type=jnp.float32)

        o_ref[...] = jnp.maximum(acc2, 0.0).astype(o_ref.dtype)

    return kernel


# ------------------------------ forward wrapper ----------------------------- #

def residual_block_forward(x_nchw, params, stride):
    n, cin, h, w = x_nchw.shape
    cout = params["w1"].shape[0]
    s = int(stride)
    k = 3
    ho = (h + 2 - k) // s + 1
    wo = (w + 2 - k) // s + 1
    hq = (k - 1) // s + ho                      # per-phase rows needed by any tap
    wq = (k - 1) // s + wo
    cpi = _round_up(cin, _LANE)                 # lane-dense / MXU-aligned channels
    cpo = _round_up(cout, _LANE)

    # NCHW -> NHWC, channel-pad (lane dense), spatial zero-pad for conv padding=1
    x = jnp.transpose(x_nchw, (0, 2, 3, 1))
    x = jnp.pad(x, ((0, 0), (1, 1), (1, 1), (0, cpi - cin)))

    # Stride phase decomposition: x_ph[n, ph*s+pw, i, j, c] = x_pad[n, i*s+ph, j*s+pw, c]
    # (same total bytes as x_pad; lets the kernel use contiguous static slices only)
    phases = []
    for ph in range(s):
        for pw in range(s):
            sl = x[:, ph::s, pw::s, :][:, :hq, :wq, :]
            dh, dw = hq - sl.shape[1], wq - sl.shape[2]
            if dh or dw:
                sl = jnp.pad(sl, ((0, 0), (0, dh), (0, dw), (0, 0)))
            phases.append(sl)
    x_ph = jnp.stack(phases, axis=1).reshape(n * s * s, hq, wq, cpi).astype(jnp.bfloat16)

    # Fold BN: scale goes into the weights (bf16), bias stays f32 for the epilogue
    sc1, b1 = _fold_bn(params["g1"], params["b1"], params["m1"], params["v1"])
    sc2, b2 = _fold_bn(params["g2"], params["b2"], params["m2"], params["v2"])
    w1 = _prep_conv3x3(params["w1"], sc1, cpi, cpo)
    w2 = _prep_conv3x3(params["w2"], sc2, cpo, cpo)

    if s != 1 or cin != cout:
        scs, bsv = _fold_bn(params["gs"], params["bs"], params["ms"], params["vs"])
        ws = (params["ws"][:, :, 0, 0] * scs[:, None]).T          # (Cin, Cout), scaled
    else:
        ws = jnp.eye(cin, dtype=jnp.float32)                      # identity shortcut
        bsv = jnp.zeros((cout,), jnp.float32)
    ws_p = jnp.zeros((cpi, cpo), jnp.float32).at[:cin, :cout].set(ws).astype(jnp.bfloat16)

    b1p, b2p, bsp = _pad_bias(b1, cpo), _pad_bias(b2, cpo), _pad_bias(bsv, cpo)

    kernel = _make_resblock_kernel(ho, wo, s, cpi, cpo)
    out_flat = pl.pallas_call(
        kernel,
        out_shape=jax.ShapeDtypeStruct((n * ho * wo, cpo), jnp.float32),
        grid=(n,),
        in_specs=[
            pl.BlockSpec((s * s, hq, wq, cpi), lambda b: (b, 0, 0, 0)),  # input phases
            pl.BlockSpec((9, cpi, cpo), lambda b: (0, 0, 0)),            # w1 (scaled)
            pl.BlockSpec((1, cpo), lambda b: (0, 0)),                    # bn1 bias
            pl.BlockSpec((9, cpo, cpo), lambda b: (0, 0, 0)),            # w2 (scaled)
            pl.BlockSpec((1, cpo), lambda b: (0, 0)),                    # bn2 bias
            pl.BlockSpec((cpi, cpo), lambda b: (0, 0)),                  # shortcut w
            pl.BlockSpec((1, cpo), lambda b: (0, 0)),                    # shortcut bias
        ],
        out_specs=pl.BlockSpec((ho * wo, cpo), lambda b: (b, 0)),        # lane-dense out
        scratch_shapes=[pltpu.VMEM((ho + 2, wo + 2, cpo), jnp.bfloat16)],  # out1 halo
        compiler_params=pltpu.CompilerParams(
            dimension_semantics=("parallel",),        # batch axis -> megacore / 2 TC
            vmem_limit_bytes=48 * 1024 * 1024,        # explicit, safe on v5e/v6e/v7x
        ),
    )(x_ph, w1, b1p, w2, b2p, ws_p, bsp)

    out = out_flat.reshape(n, ho, wo, cpo)[:, :, :, :cout]
    return jnp.transpose(out, (0, 3, 1, 2))           # NHWC -> NCHW


# -------------------------- deterministic params ---------------------------- #

def init_params(key, cin, cout, need_shortcut):
    ks = jax.random.split(key, 16)
    p = {
        "w1": 0.1 * jax.random.normal(ks[0], (cout, cin, 3, 3), jnp.float32),
        "g1": 1.0 + 0.1 * jax.random.normal(ks[1], (cout,), jnp.float32),
        "b1": 0.1 * jax.random.normal(ks[2], (cout,), jnp.float32),
        "m1": 0.1 * jax.random.normal(ks[3], (cout,), jnp.float32),
        "v1": 1.0 + 0.5 * jax.random.uniform(ks[4], (cout,), jnp.float32),
        "w2": 0.1 * jax.random.normal(ks[5], (cout, cout, 3, 3), jnp.float32),
        "g2": 1.0 + 0.1 * jax.random.normal(ks[6], (cout,), jnp.float32),
        "b2": 0.1 * jax.random.normal(ks[7], (cout,), jnp.float32),
        "m2": 0.1 * jax.random.normal(ks[8], (cout,), jnp.float32),
        "v2": 1.0 + 0.5 * jax.random.uniform(ks[9], (cout,), jnp.float32),
    }
    if need_shortcut:
        p.update({
            "ws": 0.1 * jax.random.normal(ks[10], (cout, cin, 1, 1), jnp.float32),
            "gs": 1.0 + 0.1 * jax.random.normal(ks[11], (cout,), jnp.float32),
            "bs": 0.1 * jax.random.normal(ks[12], (cout,), jnp.float32),
            "ms": 0.1 * jax.random.normal(ks[13], (cout,), jnp.float32),
            "vs": 1.0 + 0.5 * jax.random.uniform(ks[14], (cout,), jnp.float32),
        })
    return p


# ----------------------------- plain-JAX reference -------------------------- #

def reference_forward(x, params, stride):
    def conv(x, w, s, pad):
        return jax.lax.conv_general_dilated(
            x, w, (s, s), [(pad, pad), (pad, pad)],
            dimension_numbers=("NCHW", "OIHW", "NCHW"))

    def bn(y, g, b, m, v):
        inv = (g / jnp.sqrt(v + _EPS))[None, :, None, None]
        return (y - m[None, :, None, None]) * inv + b[None, :, None, None]

    cout, cin = params["w1"].shape[0], params["w1"].shape[1]
    out = conv(x, params["w1"], stride, 1)
    out = jax.nn.relu(bn(out, params["g1"], params["b1"], params["m1"], params["v1"]))
    out = conv(out, params["w2"], 1, 1)
    out = bn(out, params["g2"], params["b2"], params["m2"], params["v2"])
    if stride != 1 or cin != cout:
        sc = conv(x, params["ws"], stride, 0)
        sc = bn(sc, params["gs"], params["bs"], params["ms"], params["vs"])
    else:
        sc = x
    return jax.nn.relu(out + sc)


# ---------------------------------- main ------------------------------------ #

if __name__ == "__main__":
    key = jax.random.PRNGKey(0)

    # Case 1: downsampling block (stride 2, channel change) -> conv1x1+BN shortcut
    n, cin, h, w = 2, 4, 16, 16
    cout, stride = 8, 2
    kx, kp, key = jax.random.split(key, 3)
    x = jax.random.normal(kx, (n, cin, h, w), jnp.float32)
    params = init_params(kp, cin, cout, need_shortcut=True)
    out = jax.block_until_ready(residual_block_forward(x, params, stride))
    ref = reference_forward(x, params, stride)
    assert out.shape == ref.shape, (out.shape, ref.shape)
    err = float(jnp.max(jnp.abs(out - ref)))
    # bf16 MXU operands (f32 accumulation) -> loosened tolerance vs f32 reference
    assert err < 6e-2, f"stride-2 block mismatch vs reference, max abs err {err}"

    # Case 2: identity-shortcut block (stride 1, Cin == Cout)
    n2, c2, h2 = 2, 8, 8
    kx2, kp2 = jax.random.split(key)
    x2 = jax.random.normal(kx2, (n2, c2, h2, h2), jnp.float32)
    params2 = init_params(kp2, c2, c2, need_shortcut=False)
    out2 = jax.block_until_ready(residual_block_forward(x2, params2, 1))
    ref2 = reference_forward(x2, params2, 1)
    assert out2.shape == ref2.shape, (out2.shape, ref2.shape)
    err2 = float(jnp.max(jnp.abs(out2 - ref2)))
    assert err2 < 6e-2, f"identity block mismatch vs reference, max abs err {err2}"

    print("KERNEL_OK")
</pallas_src>

<mosaic_0001>
module attributes {stable_mosaic.version = 11 : i64} {
  func.func @kernel(%arg0: i32, %arg1: memref<4x9x9x128xbf16, #tpu.memory_space<vmem>>, %arg2: memref<9x128x128xbf16, #tpu.memory_space<vmem>>, %arg3: memref<1x128xf32, #tpu.memory_space<vmem>>, %arg4: memref<9x128x128xbf16, #tpu.memory_space<vmem>>, %arg5: memref<1x128xf32, #tpu.memory_space<vmem>>, %arg6: memref<128x128xbf16, #tpu.memory_space<vmem>>, %arg7: memref<1x128xf32, #tpu.memory_space<vmem>>, %arg8: memref<64x128xf32, #tpu.memory_space<vmem>>, %arg9: memref<10x10x128xbf16, #tpu.memory_space<vmem>>) attributes {dimension_semantics = [#tpu.dimension_semantics<parallel>], iteration_bounds = array<i64: 2>, scalar_prefetch = 0 : i64, scratch_operands = 1 : i64, tpu.core_type = #tpu.core_type<tc>, window_params = [{transform_indices = @transform_0, window_bounds = array<i64: 4, 9, 9, 128>}, {pipeline_mode = #tpu.pipeline_mode<synchronous>, transform_indices = @transform_1, window_bounds = array<i64: 9, 128, 128>}, {pipeline_mode = #tpu.pipeline_mode<synchronous>, transform_indices = @transform_2, window_bounds = array<i64: 1, 128>}, {pipeline_mode = #tpu.pipeline_mode<synchronous>, transform_indices = @transform_3, window_bounds = array<i64: 9, 128, 128>}, {pipeline_mode = #tpu.pipeline_mode<synchronous>, transform_indices = @transform_4, window_bounds = array<i64: 1, 128>}, {pipeline_mode = #tpu.pipeline_mode<synchronous>, transform_indices = @transform_5, window_bounds = array<i64: 128, 128>}, {pipeline_mode = #tpu.pipeline_mode<synchronous>, transform_indices = @transform_6, window_bounds = array<i64: 1, 128>}, {transform_indices = @transform_7, window_bounds = array<i64: 64, 128>}]} {
    %cst = arith.constant 0.000000e+00 : f32
    %0 = vector.broadcast %cst : f32 to vector<64x128xf32>
    %c0 = arith.constant 0 : index
    %c0_0 = arith.constant 0 : index
    %c0_1 = arith.constant 0 : index
    %c0_2 = arith.constant 0 : index
    %1 = vector.load %arg1[%c0, %c0_0, %c0_1, %c0_2] : memref<4x9x9x128xbf16, #tpu.memory_space<vmem>>, vector<1x8x8x128xbf16>
    %2 = vector.shape_cast %1 : vector<1x8x8x128xbf16> to vector<8x8x128xbf16>
    %3 = vector.shape_cast %2 : vector<8x8x128xbf16> to vector<64x128xbf16>
    %c0_3 = arith.constant 0 : index
    %c0_4 = arith.constant 0 : index
    %c0_5 = arith.constant 0 : index
    %4 = vector.load %arg2[%c0_3, %c0_4, %c0_5] : memref<9x128x128xbf16, #tpu.memory_space<vmem>>, vector<1x128x128xbf16>
    %5 = vector.shape_cast %4 : vector<1x128x128xbf16> to vector<128x128xbf16>
    %cst_6 = arith.constant dense<0.000000e+00> : vector<64x128xf32>
    %6 = tpu.matmul %3, %5, %cst_6 {dimension_numbers = #tpu.dot_dimension_numbers<[1], [0], [0], [1], [0, 0, 1, 1], [], []>} : vector<64x128xbf16>, vector<128x128xbf16>, vector<64x128xf32> -> vector<64x128xf32>
    %7 = arith.addf %0, %6 : vector<64x128xf32>
    %c1 = arith.constant 1 : index
    %c0_7 = arith.constant 0 : index
    %c0_8 = arith.constant 0 : index
    %c0_9 = arith.constant 0 : index
    %8 = vector.load %arg1[%c1, %c0_7, %c0_8, %c0_9] : memref<4x9x9x128xbf16, #tpu.memory_space<vmem>>, vector<1x8x8x128xbf16>
    %9 = vector.shape_cast %8 : vector<1x8x8x128xbf16> to vector<8x8x128xbf16>
    %10 = vector.shape_cast %9 : vector<8x8x128xbf16> to vector<64x128xbf16>
    %c1_10 = arith.constant 1 : index
    %c0_11 = arith.constant 0 : index
    %c0_12 = arith.constant 0 : index
    %11 = vector.load %arg2[%c1_10, %c0_11, %c0_12] : memref<9x128x128xbf16, #tpu.memory_space<vmem>>, vector<1x128x128xbf16>
    %12 = vector.shape_cast %11 : vector<1x128x128xbf16> to vector<128x128xbf16>
    %cst_13 = arith.constant dense<0.000000e+00> : vector<64x128xf32>
    %13 = tpu.matmul %10, %12, %cst_13 {dimension_numbers = #tpu.dot_dimension_numbers<[1], [0], [0], [1], [0, 0, 1, 1], [], []>} : vector<64x128xbf16>, vector<128x128xbf16>, vector<64x128xf32> -> vector<64x128xf32>
    %14 = arith.addf %7, %13 : vector<64x128xf32>
    %c0_14 = arith.constant 0 : index
    %c0_15 = arith.constant 0 : index
    %c1_16 = arith.constant 1 : index
    %c0_17 = arith.constant 0 : index
    %15 = vector.load %arg1[%c0_14, %c0_15, %c1_16, %c0_17] : memref<4x9x9x128xbf16, #tpu.memory_space<vmem>>, vector<1x8x8x128xbf16>
    %16 = vector.shape_cast %15 : vector<1x8x8x128xbf16> to vector<8x8x128xbf16>
    %17 = vector.shape_cast %16 : vector<8x8x128xbf16> to vector<64x128xbf16>
    %c2 = arith.constant 2 : index
    %c0_18 = arith.constant 0 : index
    %c0_19 = arith.constant 0 : index
    %18 = vector.load %arg2[%c2, %c0_18, %c0_19] : memref<9x128x128xbf16, #tpu.memory_space<vmem>>, vector<1x128x128xbf16>
    %19 = vector.shape_cast %18 : vector<1x128x128xbf16> to vector<128x128xbf16>
    %cst_20 = arith.constant dense<0.000000e+00> : vector<64x128xf32>
    %20 = tpu.matmul %17, %19, %cst_20 {dimension_numbers = #tpu.dot_dimension_numbers<[1], [0], [0], [1], [0, 0, 1, 1], [], []>} : vector<64x128xbf16>, vector<128x128xbf16>, vector<64x128xf32> -> vector<64x128xf32>
    %21 = arith.addf %14, %20 : vector<64x128xf32>
    %c2_21 = arith.constant 2 : index
    %c0_22 = arith.constant 0 : index
    %c0_23 = arith.constant 0 : index
    %c0_24 = arith.constant 0 : index
    %22 = vector.load %arg1[%c2_21, %c0_22, %c0_23, %c0_24] : memref<4x9x9x128xbf16, #tpu.memory_space<vmem>>, vector<1x8x8x128xbf16>
    %23 = vector.shape_cast %22 : vector<1x8x8x128xbf16> to vector<8x8x128xbf16>
    %24 = vector.shape_cast %23 : vector<8x8x128xbf16> to vector<64x128xbf16>
    %c3 = arith.constant 3 : index
    %c0_25 = arith.constant 0 : index
    %c0_26 = arith.constant 0 : index
    %25 = vector.load %arg2[%c3, %c0_25, %c0_26] : memref<9x128x128xbf16, #tpu.memory_space<vmem>>, vector<1x128x128xbf16>
    %26 = vector.shape_cast %25 : vector<1x128x128xbf16> to vector<128x128xbf16>
    %cst_27 = arith.constant dense<0.000000e+00> : vector<64x128xf32>
    %27 = tpu.matmul %24, %26, %cst_27 {dimension_numbers = #tpu.dot_dimension_numbers<[1], [0], [0], [1], [0, 0, 1, 1], [], []>} : vector<64x128xbf16>, vector<128x128xbf16>, vector<64x128xf32> -> vector<64x128xf32>
    %28 = arith.addf %21, %27 : vector<64x128xf32>
    %c3_28 = arith.constant 3 : index
    %c0_29 = arith.constant 0 : index
    %c0_30 = arith.constant 0 : index
    %c0_31 = arith.constant 0 : index
    %29 = vector.load %arg1[%c3_28, %c0_29, %c0_30, %c0_31] : memref<4x9x9x128xbf16, #tpu.memory_space<vmem>>, vector<1x8x8x128xbf16>
    %30 = vector.shape_cast %29 : vector<1x8x8x128xbf16> to vector<8x8x128xbf16>
    %31 = vector.shape_cast %30 : vector<8x8x128xbf16> to vector<64x128xbf16>
    %c4 = arith.constant 4 : index
    %c0_32 = arith.constant 0 : index
    %c0_33 = arith.constant 0 : index
    %32 = vector.load %arg2[%c4, %c0_32, %c0_33] : memref<9x128x128xbf16, #tpu.memory_space<vmem>>, vector<1x128x128xbf16>
    %33 = vector.shape_cast %32 : vector<1x128x128xbf16> to vector<128x128xbf16>
    %cst_34 = arith.constant dense<0.000000e+00> : vector<64x128xf32>
    %34 = tpu.matmul %31, %33, %cst_34 {dimension_numbers = #tpu.dot_dimension_numbers<[1], [0], [0], [1], [0, 0, 1, 1], [], []>} : vector<64x128xbf16>, vector<128x128xbf16>, vector<64x128xf32> -> vector<64x128xf32>
    %35 = arith.addf %28, %34 : vector<64x128xf32>
    %c2_35 = arith.constant 2 : index
    %c0_36 = arith.constant 0 : index
    %c1_37 = arith.constant 1 : index
    %c0_38 = arith.constant 0 : index
    %36 = vector.load %arg1[%c2_35, %c0_36, %c1_37, %c0_38] : memref<4x9x9x128xbf16, #tpu.memory_space<vmem>>, vector<1x8x8x128xbf16>
    %37 = vector.shape_cast %36 : vector<1x8x8x128xbf16> to vector<8x8x128xbf16>
    %38 = vector.shape_cast %37 : vector<8x8x128xbf16> to vector<64x128xbf16>
    %c5 = arith.constant 5 : index
    %c0_39 = arith.constant 0 : index
    %c0_40 = arith.constant 0 : index
    %39 = vector.load %arg2[%c5, %c0_39, %c0_40] : memref<9x128x128xbf16, #tpu.memory_space<vmem>>, vector<1x128x128xbf16>
    %40 = vector.shape_cast %39 : vector<1x128x128xbf16> to vector<128x128xbf16>
    %cst_41 = arith.constant dense<0.000000e+00> : vector<64x128xf32>
    %41 = tpu.matmul %38, %40, %cst_41 {dimension_numbers = #tpu.dot_dimension_numbers<[1], [0], [0], [1], [0, 0, 1, 1], [], []>} : vector<64x128xbf16>, vector<128x128xbf16>, vector<64x128xf32> -> vector<64x128xf32>
    %42 = arith.addf %35, %41 : vector<64x128xf32>
    %c0_42 = arith.constant 0 : index
    %c1_43 = arith.constant 1 : index
    %c0_44 = arith.constant 0 : index
    %c0_45 = arith.constant 0 : index
    %43 = vector.load %arg1[%c0_42, %c1_43, %c0_44, %c0_45] : memref<4x9x9x128xbf16, #tpu.memory_space<vmem>>, vector<1x8x8x128xbf16>
    %44 = vector.shape_cast %43 : vector<1x8x8x128xbf16> to vector<8x8x128xbf16>
    %45 = vector.shape_cast %44 : vector<8x8x128xbf16> to vector<64x128xbf16>
    %c6 = arith.constant 6 : index
    %c0_46 = arith.constant 0 : index
    %c0_47 = arith.constant 0 : index
    %46 = vector.load %arg2[%c6, %c0_46, %c0_47] : memref<9x128x128xbf16, #tpu.memory_space<vmem>>, vector<1x128x128xbf16>
    %47 = vector.shape_cast %46 : vector<1x128x128xbf16> to vector<128x128xbf16>
    %cst_48 = arith.constant dense<0.000000e+00> : vector<64x128xf32>
    %48 = tpu.matmul %45, %47, %cst_48 {dimension_numbers = #tpu.dot_dimension_numbers<[1], [0], [0], [1], [0, 0, 1, 1], [], []>} : vector<64x128xbf16>, vector<128x128xbf16>, vector<64x128xf32> -> vector<64x128xf32>
    %49 = arith.addf %42, %48 : vector<64x128xf32>
    %c1_49 = arith.constant 1 : index
    %c1_50 = arith.constant 1 : index
    %c0_51 = arith.constant 0 : index
    %c0_52 = arith.constant 0 : index
    %50 = vector.load %arg1[%c1_49, %c1_50, %c0_51, %c0_52] : memref<4x9x9x128xbf16, #tpu.memory_space<vmem>>, vector<1x8x8x128xbf16>
    %51 = vector.shape_cast %50 : vector<1x8x8x128xbf16> to vector<8x8x128xbf16>
    %52 = vector.shape_cast %51 : vector<8x8x128xbf16> to vector<64x128xbf16>
    %c7 = arith.constant 7 : index
    %c0_53 = arith.constant 0 : index
    %c0_54 = arith.constant 0 : index
    %53 = vector.load %arg2[%c7, %c0_53, %c0_54] : memref<9x128x128xbf16, #tpu.memory_space<vmem>>, vector<1x128x128xbf16>
    %54 = vector.shape_cast %53 : vector<1x128x128xbf16> to vector<128x128xbf16>
    %cst_55 = arith.constant dense<0.000000e+00> : vector<64x128xf32>
    %55 = tpu.matmul %52, %54, %cst_55 {dimension_numbers = #tpu.dot_dimension_numbers<[1], [0], [0], [1], [0, 0, 1, 1], [], []>} : vector<64x128xbf16>, vector<128x128xbf16>, vector<64x128xf32> -> vector<64x128xf32>
    %56 = arith.addf %49, %55 : vector<64x128xf32>
    %c0_56 = arith.constant 0 : index
    %c1_57 = arith.constant 1 : index
    %c1_58 = arith.constant 1 : index
    %c0_59 = arith.constant 0 : index
    %57 = vector.load %arg1[%c0_56, %c1_57, %c1_58, %c0_59] : memref<4x9x9x128xbf16, #tpu.memory_space<vmem>>, vector<1x8x8x128xbf16>
    %58 = vector.shape_cast %57 : vector<1x8x8x128xbf16> to vector<8x8x128xbf16>
    %59 = vector.shape_cast %58 : vector<8x8x128xbf16> to vector<64x128xbf16>
    %c8 = arith.constant 8 : index
    %c0_60 = arith.constant 0 : index
    %c0_61 = arith.constant 0 : index
    %60 = vector.load %arg2[%c8, %c0_60, %c0_61] : memref<9x128x128xbf16, #tpu.memory_space<vmem>>, vector<1x128x128xbf16>
    %61 = vector.shape_cast %60 : vector<1x128x128xbf16> to vector<128x128xbf16>
    %cst_62 = arith.constant dense<0.000000e+00> : vector<64x128xf32>
    %62 = tpu.matmul %59, %61, %cst_62 {dimension_numbers = #tpu.dot_dimension_numbers<[1], [0], [0], [1], [0, 0, 1, 1], [], []>} : vector<64x128xbf16>, vector<128x128xbf16>, vector<64x128xf32> -> vector<64x128xf32>
    %63 = arith.addf %56, %62 : vector<64x128xf32>
    %c0_63 = arith.constant 0 : index
    %c0_64 = arith.constant 0 : index
    %64 = vector.load %arg3[%c0_63, %c0_64] : memref<1x128xf32, #tpu.memory_space<vmem>>, vector<1x128xf32>
    %65 = vector.broadcast %64 : vector<1x128xf32> to vector<64x128xf32>
    %66 = arith.addf %63, %65 : vector<64x128xf32>
    %cst_65 = arith.constant 0.000000e+00 : f32
    %67 = vector.broadcast %cst_65 : f32 to vector<64x128xf32>
    %68 = arith.maximumf %66, %67 : vector<64x128xf32>
    %cst_66 = arith.constant 0.000000e+00 : bf16
    %69 = vector.broadcast %cst_66 : bf16 to vector<10x10x128xbf16>
    %c0_67 = arith.constant 0 : index
    %c0_68 = arith.constant 0 : index
    %c0_69 = arith.constant 0 : index
    %70 = vector.load %arg9[%c0_67, %c0_68, %c0_69] : memref<10x10x128xbf16, #tpu.memory_space<vmem>>, vector<10x10x128xbf16>
    tpu.vector_store %arg9[%c0_67, %c0_68, %c0_69], %69 {strides = array<i32>} : memref<10x10x128xbf16, #tpu.memory_space<vmem>>, vector<10x10x128xbf16>,
    %71 = vector.shape_cast %68 : vector<64x128xf32> to vector<8x8x128xf32>
    %72 = arith.truncf %71 : vector<8x8x128xf32> to vector<8x8x128xbf16>
    %c1_70 = arith.constant 1 : index
    %c1_71 = arith.constant 1 : index
    %c0_72 = arith.constant 0 : index
    %73 = vector.load %arg9[%c1_70, %c1_71, %c0_72] : memref<10x10x128xbf16, #tpu.memory_space<vmem>>, vector<8x8x128xbf16>
    tpu.vector_store %arg9[%c1_70, %c1_71, %c0_72], %72 {strides = array<i32>} : memref<10x10x128xbf16, #tpu.memory_space<vmem>>, vector<8x8x128xbf16>,
    %c3_73 = arith.constant 3 : index
    %c0_74 = arith.constant 0 : index
    %c0_75 = arith.constant 0 : index
    %c0_76 = arith.constant 0 : index
    %74 = vector.load %arg1[%c3_73, %c0_74, %c0_75, %c0_76] : memref<4x9x9x128xbf16, #tpu.memory_space<vmem>>, vector<1x8x8x128xbf16>
    %75 = vector.shape_cast %74 : vector<1x8x8x128xbf16> to vector<8x8x128xbf16>
    %76 = vector.shape_cast %75 : vector<8x8x128xbf16> to vector<64x128xbf16>
    %c0_77 = arith.constant 0 : index
    %c0_78 = arith.constant 0 : index
    %77 = vector.load %arg6[%c0_77, %c0_78] : memref<128x128xbf16, #tpu.memory_space<vmem>>, vector<128x128xbf16>
    %cst_79 = arith.constant dense<0.000000e+00> : vector<64x128xf32>
    %78 = tpu.matmul %76, %77, %cst_79 {dimension_numbers = #tpu.dot_dimension_numbers<[1], [0], [0], [1], [0, 0, 1, 1], [], []>} : vector<64x128xbf16>, vector<128x128xbf16>, vector<64x128xf32> -> vector<64x128xf32>
    %c0_80 = arith.constant 0 : index
    %c0_81 = arith.constant 0 : index
    %79 = vector.load %arg7[%c0_80, %c0_81] : memref<1x128xf32, #tpu.memory_space<vmem>>, vector<1x128xf32>
    %80 = vector.broadcast %79 : vector<1x128xf32> to vector<64x128xf32>
    %81 = arith.addf %78, %80 : vector<64x128xf32>
    %c0_82 = arith.constant 0 : index
    %c0_83 = arith.constant 0 : index
    %82 = vector.load %arg5[%c0_82, %c0_83] : memref<1x128xf32, #tpu.memory_space<vmem>>, vector<1x128xf32>
    %83 = vector.broadcast %82 : vector<1x128xf32> to vector<64x128xf32>
    %84 = arith.addf %81, %83 : vector<64x128xf32>
    %c0_84 = arith.constant 0 : index
    %c0_85 = arith.constant 0 : index
    %c0_86 = arith.constant 0 : index
    %85 = vector.load %arg9[%c0_84, %c0_85, %c0_86] : memref<10x10x128xbf16, #tpu.memory_space<vmem>>, vector<8x8x128xbf16>
    %86 = vector.shape_cast %85 : vector<8x8x128xbf16> to vector<64x128xbf16>
    %c0_87 = arith.constant 0 : index
    %c0_88 = arith.constant 0 : index
    %c0_89 = arith.constant 0 : index
    %87 = vector.load %arg4[%c0_87, %c0_88, %c0_89] : memref<9x128x128xbf16, #tpu.memory_space<vmem>>, vector<1x128x128xbf16>
    %88 = vector.shape_cast %87 : vector<1x128x128xbf16> to vector<128x128xbf16>
    %cst_90 = arith.constant dense<0.000000e+00> : vector<64x128xf32>
    %89 = tpu.matmul %86, %88, %cst_90 {dimension_numbers = #tpu.dot_dimension_numbers<[1], [0], [0], [1], [0, 0, 1, 1], [], []>} : vector<64x128xbf16>, vector<128x128xbf16>, vector<64x128xf32> -> vector<64x128xf32>
    %90 = arith.addf %84, %89 : vector<64x128xf32>
    %c0_91 = arith.constant 0 : index
    %c1_92 = arith.constant 1 : index
    %c0_93 = arith.constant 0 : index
    %91 = vector.load %arg9[%c0_91, %c1_92, %c0_93] : memref<10x10x128xbf16, #tpu.memory_space<vmem>>, vector<8x8x128xbf16>
    %92 = vector.shape_cast %91 : vector<8x8x128xbf16> to vector<64x128xbf16>
    %c1_94 = arith.constant 1 : index
    %c0_95 = arith.constant 0 : index
    %c0_96 = arith.constant 0 : index
    %93 = vector.load %arg4[%c1_94, %c0_95, %c0_96] : memref<9x128x128xbf16, #tpu.memory_space<vmem>>, vector<1x128x128xbf16>
    %94 = vector.shape_cast %93 : vector<1x128x128xbf16> to vector<128x128xbf16>
    %cst_97 = arith.constant dense<0.000000e+00> : vector<64x128xf32>
    %95 = tpu.matmul %92, %94, %cst_97 {dimension_numbers = #tpu.dot_dimension_numbers<[1], [0], [0], [1], [0, 0, 1, 1], [], []>} : vector<64x128xbf16>, vector<128x128xbf16>, vector<64x128xf32> -> vector<64x128xf32>
    %96 = arith.addf %90, %95 : vector<64x128xf32>
    %c0_98 = arith.constant 0 : index
    %c2_99 = arith.constant 2 : index
    %c0_100 = arith.constant 0 : index
    %97 = vector.load %arg9[%c0_98, %c2_99, %c0_100] : memref<10x10x128xbf16, #tpu.memory_space<vmem>>, vector<8x8x128xbf16>
    %98 = vector.shape_cast %97 : vector<8x8x128xbf16> to vector<64x128xbf16>
    %c2_101 = arith.constant 2 : index
    %c0_102 = arith.constant 0 : index
    %c0_103 = arith.constant 0 : index
    %99 = vector.load %arg4[%c2_101, %c0_102, %c0_103] : memref<9x128x128xbf16, #tpu.memory_space<vmem>>, vector<1x128x128xbf16>
    %100 = vector.shape_cast %99 : vector<1x128x128xbf16> to vector<128x128xbf16>
    %cst_104 = arith.constant dense<0.000000e+00> : vector<64x128xf32>
    %101 = tpu.matmul %98, %100, %cst_104 {dimension_numbers = #tpu.dot_dimension_numbers<[1], [0], [0], [1], [0, 0, 1, 1], [], []>} : vector<64x128xbf16>, vector<128x128xbf16>, vector<64x128xf32> -> vector<64x128xf32>
    %102 = arith.addf %96, %101 : vector<64x128xf32>
    %c1_105 = arith.constant 1 : index
    %c0_106 = arith.constant 0 : index
    %c0_107 = arith.constant 0 : index
    %103 = vector.load %arg9[%c1_105, %c0_106, %c0_107] : memref<10x10x128xbf16, #tpu.memory_space<vmem>>, vector<8x8x128xbf16>
    %104 = vector.shape_cast %103 : vector<8x8x128xbf16> to vector<64x128xbf16>
    %c3_108 = arith.constant 3 : index
    %c0_109 = arith.constant 0 : index
    %c0_110 = arith.constant 0 : index
    %105 = vector.load %arg4[%c3_108, %c0_109, %c0_110] : memref<9x128x128xbf16, #tpu.memory_space<vmem>>, vector<1x128x128xbf16>
    %106 = vector.shape_cast %105 : vector<1x128x128xbf16> to vector<128x128xbf16>
    %cst_111 = arith.constant dense<0.000000e+00> : vector<64x128xf32>
    %107 = tpu.matmul %104, %106, %cst_111 {dimension_numbers = #tpu.dot_dimension_numbers<[1], [0], [0], [1], [0, 0, 1, 1], [], []>} : vector<64x128xbf16>, vector<128x128xbf16>, vector<64x128xf32> -> vector<64x128xf32>
    %108 = arith.addf %102, %107 : vector<64x128xf32>
    %c1_112 = arith.constant 1 : index
    %c1_113 = arith.constant 1 : index
    %c0_114 = arith.constant 0 : index
    %109 = vector.load %arg9[%c1_112, %c1_113, %c0_114] : memref<10x10x128xbf16, #tpu.memory_space<vmem>>, vector<8x8x128xbf16>
    %110 = vector.shape_cast %109 : vector<8x8x128xbf16> to vector<64x128xbf16>
    %c4_115 = arith.constant 4 : index
    %c0_116 = arith.constant 0 : index
    %c0_117 = arith.constant 0 : index
    %111 = vector.load %arg4[%c4_115, %c0_116, %c0_117] : memref<9x128x128xbf16, #tpu.memory_space<vmem>>, vector<1x128x128xbf16>
    %112 = vector.shape_cast %111 : vector<1x128x128xbf16> to vector<128x128xbf16>
    %cst_118 = arith.constant dense<0.000000e+00> : vector<64x128xf32>
    %113 = tpu.matmul %110, %112, %cst_118 {dimension_numbers = #tpu.dot_dimension_numbers<[1], [0], [0], [1], [0, 0, 1, 1], [], []>} : vector<64x128xbf16>, vector<128x128xbf16>, vector<64x128xf32> -> vector<64x128xf32>
    %114 = arith.addf %108, %113 : vector<64x128xf32>
    %c1_119 = arith.constant 1 : index
    %c2_120 = arith.constant 2 : index
    %c0_121 = arith.constant 0 : index
    %115 = vector.load %arg9[%c1_119, %c2_120, %c0_121] : memref<10x10x128xbf16, #tpu.memory_space<vmem>>, vector<8x8x128xbf16>
    %116 = vector.shape_cast %115 : vector<8x8x128xbf16> to vector<64x128xbf16>
    %c5_122 = arith.constant 5 : index
    %c0_123 = arith.constant 0 : index
    %c0_124 = arith.constant 0 : index
    %117 = vector.load %arg4[%c5_122, %c0_123, %c0_124] : memref<9x128x128xbf16, #tpu.memory_space<vmem>>, vector<1x128x128xbf16>
    %118 = vector.shape_cast %117 : vector<1x128x128xbf16> to vector<128x128xbf16>
    %cst_125 = arith.constant dense<0.000000e+00> : vector<64x128xf32>
    %119 = tpu.matmul %116, %118, %cst_125 {dimension_numbers = #tpu.dot_dimension_numbers<[1], [0], [0], [1], [0, 0, 1, 1], [], []>} : vector<64x128xbf16>, vector<128x128xbf16>, vector<64x128xf32> -> vector<64x128xf32>
    %120 = arith.addf %114, %119 : vector<64x128xf32>
    %c2_126 = arith.constant 2 : index
    %c0_127 = arith.constant 0 : index
    %c0_128 = arith.constant 0 : index
    %121 = vector.load %arg9[%c2_126, %c0_127, %c0_128] : memref<10x10x128xbf16, #tpu.memory_space<vmem>>, vector<8x8x128xbf16>
    %122 = vector.shape_cast %121 : vector<8x8x128xbf16> to vector<64x128xbf16>
    %c6_129 = arith.constant 6 : index
    %c0_130 = arith.constant 0 : index
    %c0_131 = arith.constant 0 : index
    %123 = vector.load %arg4[%c6_129, %c0_130, %c0_131] : memref<9x128x128xbf16, #tpu.memory_space<vmem>>, vector<1x128x128xbf16>
    %124 = vector.shape_cast %123 : vector<1x128x128xbf16> to vector<128x128xbf16>
    %cst_132 = arith.constant dense<0.000000e+00> : vector<64x128xf32>
    %125 = tpu.matmul %122, %124, %cst_132 {dimension_numbers = #tpu.dot_dimension_numbers<[1], [0], [0], [1], [0, 0, 1, 1], [], []>} : vector<64x128xbf16>, vector<128x128xbf16>, vector<64x128xf32> -> vector<64x128xf32>
    %126 = arith.addf %120, %125 : vector<64x128xf32>
    %c2_133 = arith.constant 2 : index
    %c1_134 = arith.constant 1 : index
    %c0_135 = arith.constant 0 : index
    %127 = vector.load %arg9[%c2_133, %c1_134, %c0_135] : memref<10x10x128xbf16, #tpu.memory_space<vmem>>, vector<8x8x128xbf16>
    %128 = vector.shape_cast %127 : vector<8x8x128xbf16> to vector<64x128xbf16>
    %c7_136 = arith.constant 7 : index
    %c0_137 = arith.constant 0 : index
    %c0_138 = arith.constant 0 : index
    %129 = vector.load %arg4[%c7_136, %c0_137, %c0_138] : memref<9x128x128xbf16, #tpu.memory_space<vmem>>, vector<1x128x128xbf16>
    %130 = vector.shape_cast %129 : vector<1x128x128xbf16> to vector<128x128xbf16>
    %cst_139 = arith.constant dense<0.000000e+00> : vector<64x128xf32>
    %131 = tpu.matmul %128, %130, %cst_139 {dimension_numbers = #tpu.dot_dimension_numbers<[1], [0], [0], [1], [0, 0, 1, 1], [], []>} : vector<64x128xbf16>, vector<128x128xbf16>, vector<64x128xf32> -> vector<64x128xf32>
    %132 = arith.addf %126, %131 : vector<64x128xf32>
    %c2_140 = arith.constant 2 : index
    %c2_141 = arith.constant 2 : index
    %c0_142 = arith.constant 0 : index
    %133 = vector.load %arg9[%c2_140, %c2_141, %c0_142] : memref<10x10x128xbf16, #tpu.memory_space<vmem>>, vector<8x8x128xbf16>
    %134 = vector.shape_cast %133 : vector<8x8x128xbf16> to vector<64x128xbf16>
    %c8_143 = arith.constant 8 : index
    %c0_144 = arith.constant 0 : index
    %c0_145 = arith.constant 0 : index
    %135 = vector.load %arg4[%c8_143, %c0_144, %c0_145] : memref<9x128x128xbf16, #tpu.memory_space<vmem>>, vector<1x128x128xbf16>
    %136 = vector.shape_cast %135 : vector<1x128x128xbf16> to vector<128x128xbf16>
    %cst_146 = arith.constant dense<0.000000e+00> : vector<64x128xf32>
    %137 = tpu.matmul %134, %136, %cst_146 {dimension_numbers = #tpu.dot_dimension_numbers<[1], [0], [0], [1], [0, 0, 1, 1], [], []>} : vector<64x128xbf16>, vector<128x128xbf16>, vector<64x128xf32> -> vector<64x128xf32>
    %138 = arith.addf %132, %137 : vector<64x128xf32>
    %cst_147 = arith.constant 0.000000e+00 : f32
    %139 = vector.broadcast %cst_147 : f32 to vector<64x128xf32>
    %140 = arith.maximumf %138, %139 : vector<64x128xf32>
    %c0_148 = arith.constant 0 : index
    %c0_149 = arith.constant 0 : index
    %141 = vector.load %arg8[%c0_148, %c0_149] : memref<64x128xf32, #tpu.memory_space<vmem>>, vector<64x128xf32>
    tpu.vector_store %arg8[%c0_148, %c0_149], %140 {strides = array<i32>} : memref<64x128xf32, #tpu.memory_space<vmem>>, vector<64x128xf32>,
    return
  }
  func.func @transform_0(%arg0: i32) -> (i32, i32, i32, i32) {
    %c0_i32 = arith.constant 0 : i32
    %c0_i32_0 = arith.constant 0 : i32
    %c0_i32_1 = arith.constant 0 : i32
    %c0_i32_2 = arith.constant 0 : i32
    return %arg0, %c0_i32, %c0_i32_0, %c0_i32_1 : i32, i32, i32, i32
  }
  func.func @transform_1(%arg0: i32) -> (i32, i32, i32) {
    %c0_i32 = arith.constant 0 : i32
    %c0_i32_0 = arith.constant 0 : i32
    %c0_i32_1 = arith.constant 0 : i32
    %c0_i32_2 = arith.constant 0 : i32
    return %c0_i32, %c0_i32_0, %c0_i32_1 : i32, i32, i32
  }
  func.func @transform_2(%arg0: i32) -> (i32, i32) {
    %c0_i32 = arith.constant 0 : i32
    %c0_i32_0 = arith.constant 0 : i32
    %c0_i32_1 = arith.constant 0 : i32
    return %c0_i32, %c0_i32_0 : i32, i32
  }
  func.func @transform_3(%arg0: i32) -> (i32, i32, i32) {
    %c0_i32 = arith.constant 0 : i32
    %c0_i32_0 = arith.constant 0 : i32
    %c0_i32_1 = arith.constant 0 : i32
    %c0_i32_2 = arith.constant 0 : i32
    return %c0_i32, %c0_i32_0, %c0_i32_1 : i32, i32, i32
  }
  func.func @transform_4(%arg0: i32) -> (i32, i32) {
    %c0_i32 = arith.constant 0 : i32
    %c0_i32_0 = arith.constant 0 : i32
    %c0_i32_1 = arith.constant 0 : i32
    return %c0_i32, %c0_i32_0 : i32, i32
  }
  func.func @transform_5(%arg0: i32) -> (i32, i32) {
    %c0_i32 = arith.constant 0 : i32
    %c0_i32_0 = arith.constant 0 : i32
    %c0_i32_1 = arith.constant 0 : i32
    return %c0_i32, %c0_i32_0 : i32, i32
  }
  func.func @transform_6(%arg0: i32) -> (i32, i32) {
    %c0_i32 = arith.constant 0 : i32
    %c0_i32_0 = arith.constant 0 : i32
    %c0_i32_1 = arith.constant 0 : i32
    return %c0_i32, %c0_i32_0 : i32, i32
  }
  func.func @transform_7(%arg0: i32) -> (i32, i32) {
    %c0_i32 = arith.constant 0 : i32
    %c0_i32_0 = arith.constant 0 : i32
    return %arg0, %c0_i32 : i32, i32
  }
}

</mosaic_0001>

<bundles_post_ra>
// kernel: tpu_custom_call.1
= control target key start
LH: loop header
LB: loop body
LE: loop exit
PB: predicated region body
PF: predicated region fallthrough
CT: control target
= control target key end

     0   :  { %12 = vsyncpa [#allocation4], 0  ;;  %s7186_s0 = inlined_call_operand.vmem [shape: bf16[8,9,9,128], index: 0, kind: input, shape index: {}]   ;;  %s7187_s1 = inlined_call_operand.vmem [shape: bf16[9,128,128], index: 1, kind: input, shape index: {}]   ;;  %s7188_s2 = inlined_call_operand.vmem [shape: f32[1,128], index: 2, kind: input, shape index: {}]   ;;  %s7189_s3 = inlined_call_operand.hbm [shape: bf16[9,128,128], index: 3, kind: input, shape index: {}]   ;;  %s7190_s4 = inlined_call_operand.vmem [shape: f32[1,128], index: 4, kind: input, shape index: {}]   ;;  %s7191_s5 = inlined_call_operand.vmem [shape: bf16[128,128], index: 5, kind: input, shape index: {}]   ;;  %s7192_s6 = inlined_call_operand.vmem [shape: f32[1,128], index: 6, kind: input, shape index: {}]   ;;  %s7193_s7 = inlined_call_operand.hbm [shape: f32[128,128], index: 7, kind: output, shape index: {}]  }
   0x1   :  { %13 = vsyncpa [#allocation5], 0 }
   0x2   :  { %15 = vsyncpa [#allocation5 + $0x1], 0  ;;  %s6387_s24 = smov 0   ;;  %s6389_s25 = smov 0  }
   0x3   :  { %s6391_s26 = smov 0   ;;  %s6393_s27 = smov 0  }
   0x4 LB: > { %s6408_s28 = sadd.s32 4294967295, %s6338_s27   ;;  %s4642_s29 = sadd.s32 4294967294, %s6338_s27   ;;  %s6338_s27 = sphi %s6393_s27, %s7217_s27   ;;  %s6334_s26 = sphi %s6391_s26, %s7216_s26   ;;  %s6330_s25 = sphi %s6389_s25, %s7215_s25   ;;  %s6326_s24 = sphi %s6387_s24, %s7214_s24  }
   0x5   : > { %s6412_s30 = sadd.s32 1, %s6338_s27   ;;  %s180_s8 = sadd.s32 1, %s6334_s26 }
   0x6   : > { %s177_s9 = ssub.s32 %s6338_s27, %s6412_s30  ;;  %p190_p0 = scmp.ne.s32.totalorder %s6334_s26, %s6330_s25 }
   0x7   : > { %p178_p1 = scmp.eq.s32.totalorder %s177_s9, 0  ;;  %p191_p2 = scmp.eq.s32.totalorder %s6408_s28, 1 }
   0x8   : > { %p196_p3 = scmp.ne.s32.totalorder %s6330_s25, %s6326_s24  ;;  %p197_p4 = scmp.eq.s32.totalorder %s4642_s29, 1 }
   0x9   : > { %s6423_s10 = scalar_select %p178_p1, %s6334_s26, %s180_s8  }
   0xa   : > { %p6425_p5 = por %p191_p2, %p190_p0  ;;  %p6429_p6 = por %p197_p4, %p196_p3 }
   0xb   : > { %p4643_p7 = scmp.ge.s32.totalorder %s6338_s27, 1  ;;  %p204_p8 = scmp.lt.s32.totalorder %s6338_s27, 3 }
   0xc   : > { %s7197_s11 = scalar_select %p6425_p5, 1, 0 }
   0xd   : > { %s7198_s12 = scalar_select %p6429_p6, 1, 0 }
   0xe   : > { %p7194_p9 = scmp.eq.s32.totalorder %s6408_s28, 0  ;;  %p6436_p10 = pnand %p4643_p7, %p204_p8 }
   0xf   : > { %s6340_s14 = smov [#allocation3]   ;;  %s6244_s19 = scalar_lea.hbm %s7189_s3, 9216 }
  0x10   : > { %s7199_s13 = scalar_select %p6436_p10, 1, 0 }
  0x11   : > { %s222_s15 = sshll.u32 %s6340_s14, 4  ;;  %p5995_p11 = pneg %p6436_p10  ;;  %s223_s15 = int_to_ptr.vmem [resolvable:$true] %s222_s15 }
  0x12   : > { %p6245_p13 = scmp.ne.s32.totalorder %s7189_s3, %s6244_s19  ;;  %p6251_p3 = scmp.lt.u32.totalorder %s6244_s19, %s7189_s3 }
  0x13   : > { %p6444_p12 = pnand %p7194_p9, %p5995_p11 }
  0x15   : > { %p6246_p0 = pneg %p6444_p12 }
  0x17   : > { %p6247_p1 = pnand %p6246_p0, %p6245_p13 }
  0x19   : > { %p6248_p2 = pneg %p6247_p1 }
  0x1b   : > { %p6253_p4 = pnand %p6251_p3, %p6248_p2 }
  0x1d   : > { %6256 = shalt.err (!%p6253_p4)
}
  0x1e   : > { %s6257_s29 = scalar_lea.vmem %s223_s15, 9216  ;;  %p6265_p9 = scmp.lt.s32.totalorder %s223_s15, %s223_s15 }
  0x1f   : > { %p6258_p7 = scmp.ne.s32.totalorder %s223_s15, %s6257_s29  ;;  %p6266_p6 = scmp.lt.s32.totalorder %s6257_s29, %s6257_s29 }
  0x21   : > { %p6260_p8 = pnand %p6258_p7, %p6246_p0  ;;  %p6267_p5 = por %p6266_p6, %p6265_p9 }
  0x23   : > { %p6261_p11 = pneg %p6260_p8 }
  0x25   : > { %p6268_p10 = pnand %p6267_p5, %p6261_p11 }
  0x27   : > { %6271 = shalt.err (!%p6268_p10)
}
  0x28   : > { %s6341_s8 = smov 64   ;;  %s6342_s9 = smov 4  }
  0x29   : > { %5998 = dma.hbm_to_vmem [thread:$0]  (!%p6444_p12), %s7189_s3, 9216, %s223_s15, [#allocation4], %s6341_s8, %s6341_s8, %s6342_s9  }
  0x2a   : > { %p7201_p13 = scmp.ne.s32.totalorder %s7199_s13, 0 }
  0x2b   : > { %p7202_p1 = scmp.eq.s32.totalorder (!%p7201_p13), %s6408_s28, 0 }
  0x2c   : > { %257 = sbr.rel (%p7201_p13) target bundleno = 1067 (0x42b), region = 48 }
  0x33   : > { %6317 = dma.done.wait (%p7202_p1), [#allocation4], 9216   ;;  %p7203_p0 = pmov %p7202_p1 }
  0x34   : > { %s4649_s18 = sshll.u32 %s6408_s28, 2  ;;  %v6044_v0 = vld [vmem:[%s7187_s1 + $0x40] sm:$0xff]   ;;  %v6045_v1 = vld [vmem:[%s7187_s1 + $0x48] sm:$0xff]   ;;  %v6046_v2 = vld [vmem:[%s7187_s1 + $0x50] sm:$0xff]   ;;  %vm639_vm0 = vsmask.f32 3328 }
  0x35   : > { %6319 = vsyncadd (%p7203_p0), [#allocation4], 4294958080  ;;  %p291_p5 = scmp.lt.s32.totalorder %s4649_s18, 7  ;;  %5364 = vmatprep.subr.bf16.mxu0 %v6044_v0  ;;  %v6047_v3 = vld [vmem:[%s7187_s1 + $0x58] sm:$0xff]   ;;  %v6048_v5 = vld [vmem:[%s7187_s1 + $0x60] sm:$0xff]   ;;  %vm2312_vm3 = vcmask 1043456  }
  0x36   : > { %5365 = vmatpush3.bf16.msra.mxu0 %v6044_v0  ;;  %v6049_v6 = vld [vmem:[%s7187_s1 + $0x68] sm:$0xff]   ;;  %v6050_v7 = vld [vmem:[%s7187_s1 + $0x70] sm:$0xff]   ;;  %v6051_v8 = vld [vmem:[%s7187_s1 + $0x78] sm:$0xff]   ;;  %vm640_vm1 = vsmask.f32 7440  ;;  %vm2318_vm5 = vcmask 1040384  }
  0x37   : > { %s7219_s18 = smov (!%p291_p5, %s4649_s18), 7  ;;  %5366 = vmatprep.subr.bf16.mxu0 %v6045_v1  ;;  %v6053_v9 = vld [vmem:[%s7187_s1] sm:$0xff]   ;;  %v6055_v12 = vld [vmem:[%s7187_s1 + $0x8] sm:$0xff]   ;;  %v6056_v13 = vld [vmem:[%s7187_s1 + $0x10] sm:$0xff]   ;;  %vm2313_vm4 = vsmask.f32 7938 }
  0x38   : > { %s5988_s13 = smul.u32 72, %s7219_s18  ;;  %v6057_v16 = vld [vmem:[%s7187_s1 + $0x18] sm:$0xff]   ;;  %v6058_v17 = vld [vmem:[%s7187_s1 + $0x20] sm:$0xff]   ;;  %v6059_v18 = vld [vmem:[%s7187_s1 + $0x28] sm:$0xff]   ;;  %vm2319_vm6 = vsmask.f32 256 }
  0x39   : > { %v6061_v23 = vld [vmem:[%s7187_s1 + $0x30] sm:$0xff]   ;;  %v6063_v27 = vld [vmem:[%s7187_s1 + $0x38] sm:$0xff]   ;;  %v6065_v35 = vld [vmem:[%s7187_s1 + $0x80] sm:$0xff]   ;;  %vm3024_vm9 = vcmask 1042432   ;;  %vm3025_vm10 = vcmask 1046532   ;;  %s287_s18 = sand.u32 1, %s6330_s25  }
  0x3a   : > { %s6483_s8 = scalar_lea.vmem %s7186_s0, %s5988_s13  ;;  %5367 = vmatpush3.bf16.msra.mxu0 %v6045_v1  ;;  %v6067_v42 = vld [vmem:[%s7187_s1 + $0x88] sm:$0xff]   ;;  %vm6545_vm2 = vmor %vm639_vm0, %vm640_vm1  ;;  %v6068_v51 = vld [vmem:[%s7187_s1 + $0x90] sm:$0xff]   ;;  %s4648_s19 = sshll.u32 %s287_s18, 6 }
  0x3b   : > { %5368 = vmatprep.subr.bf16.mxu0 %v6046_v2  ;;  %v6052_v4 = vld [vmem:[%s6483_s8 + $0x48] ss:$8 sps:$4 sm:$0xff]   ;;  %v6054_v10 = vld [vmem:[%s6483_s8 + $0x58] ss:$8 sps:$4 sm:$0xff]   ;;  %v624_v26 = vld [vmem:[%s6483_s8 + $0x4] sm:$0x1] }
  0x3c   : > { %5380 = vmatprep.mubr.bf16.mxu0 %v6052_v4  ;;  %v6060_v11 = vld [vmem:[%s6483_s8 + $0x68] ss:$8 sps:$4 sm:$0xff]   ;;  %v6062_v14 = vld [vmem:[%s6483_s8 + $0x78] ss:$8 sps:$4 sm:$0xff]   ;;  %v626_v28 = vld [vmem:[%s6483_s8 + $0xc] sm:$0x1] }
  0x3d   : > { %v6064_v15 = vld [vmem:[%s6483_s8] ss:$8 sps:$4 sm:$0xff]   ;;  %v652_v33 = vshll.u32 %v624_v26, 16  ;;  %v666_v34 = vshll.u32 %v626_v28, 16  ;;  %v6066_v36 = vld [vmem:[%s6483_s8 + $0x10] ss:$8 sps:$4 sm:$0xff]   ;;  %vm6870_vm7 = vmand %vm2312_vm3, %vm2313_vm4 }
  0x3e   : > { %5369 = vmatpush3.bf16.msra.mxu0 %v6046_v2  ;;  %v623_v19 = vld [vmem:[%s6483_s8] sm:$0xf]  ;;  %v625_v20 = vld [vmem:[%s6483_s8 + $0x8] sm:$0xf]  ;;  %v627_v43 = vld [vmem:[%s6483_s8 + $0x10] sm:$0xf] }
  0x3f   : > { %5370 = vmatprep.subr.bf16.mxu0 %v6047_v3  ;;  %v643_v21 = vshrl.u32 %v623_v19, 16  ;;  %v646_v22 = vshll.u32 %v623_v19, 16  ;;  %v657_v24 = vshrl.u32 %v625_v20, 16  ;;  %v660_v25 = vshll.u32 %v625_v20, 16  ;;  %v6072_v39 = vld [vmem:[%s6483_s8 + $0x20] ss:$8 sps:$4 sm:$0xff]   ;;  %vm6877_vm8 = vmand %vm2318_vm5, %vm2319_vm6 }
  0x40   : > { %v654_v40 = vrot.slane %v652_v33, 5  ;;  %v668_v41 = vrot.slane %v666_v34, 5  ;;  %v629_v44 = vld [vmem:[%s6483_s8 + $0x18] sm:$0xf]  ;;  %v671_v48 = vshrl.u32 %v627_v43, 16  ;;  %v674_v49 = vshll.u32 %v627_v43, 16  ;;  %vm6921_vm11 = vmor %vm3024_vm9, %vm3025_vm10 }
  0x41   : > { %v645_v29 = vrot.slane %v643_v21, 4  ;;  %v648_v30 = vrot.slane %v646_v22, 5  ;;  %v659_v31 = vrot.slane %v657_v24, 4  ;;  %v662_v32 = vrot.slane %v660_v25, 5  ;;  %v6074_v54 = vld [vmem:[%s6483_s8 + $0x30] ss:$8 sps:$4 sm:$0xff]  }
  0x42   : > { %5371 = vmatpush3.bf16.msra.mxu0 %v6047_v3  ;;  %v685_v50 = vshrl.u32 %v629_v44, 16  ;;  %v6069_v55 = vld [vmem:[%s7187_s1 + $0x98] sm:$0xff]   ;;  %v673_v56 = vrot.slane %v671_v48, 4  ;;  %v688_v57 = vshll.u32 %v629_v44, 16  ;;  %v676_v59 = vrot.slane %v674_v49, 5  ;;  %v6070_v4 = vld [vmem:[%s7187_s1 + $0xa0] sm:$0xff]  }
  0x43   : > { %5372 = vmatprep.subr.bf16.mxu0 %v6048_v5  ;;  %v649_v37 = vor.u32 %v648_v30, %v645_v29  ;;  %v663_v38 = vor.u32 %v662_v32, %v659_v31  ;;  %v631_v61 = vld [vmem:[%s6483_s8 + $0x20] sm:$0xf]  ;;  %v628_v62 = vld [vmem:[%s6483_s8 + $0x14] sm:$0x1]  ;;  %v630_v63 = vld [vmem:[%s6483_s8 + $0x1c] sm:$0x1] }
  0x44   : > { %v687_v60 = vrot.slane %v685_v50, 4  ;;  %v633_v0 = vld [vmem:[%s6483_s8 + $0x28] sm:$0xf]  ;;  %v632_v1 = vld [vmem:[%s6483_s8 + $0x24] sm:$0x1]  ;;  %v690_v2 = vrot.slane %v688_v57, 5 }
  0x45   : > { %v650_v45 = vrot.slane %v649_v37, 4  ;;  %v664_v46 = vrot.slane %v663_v38, 4  ;;  %v699_v3 = vshrl.u32 %v631_v61, 16  ;;  %v637_v21 = vld [vmem:[%s6483_s8 + $0x38] sm:$0xf]  ;;  %v6073_v30 = vld [vmem:[%s7187_s1 + $0xb0] sm:$0xff]  }
  0x46   : > { %5373 = vmatpush3.bf16.msra.mxu0 %v6048_v5  ;;  %v702_v5 = vshll.u32 %v631_v61, 16  ;;  %v741_v28 = vshrl.u32 %v637_v21, 16  ;;  %v744_v29 = vshll.u32 %v637_v21, 16  ;;  %v6075_v38 = vld [vmem:[%s7187_s1 + $0xb8] sm:$0xff]   ;;  %v6093_v21 = vld [vmem:[%s7187_s1 + $0x130] sm:$0xff]   ;;  %s289_s20 = scalar_lea.vmem [#allocation6], %s4648_s19 }
  0x47   : > { %5374 = vmatprep.subr.bf16.mxu0 %v6049_v6  ;;  %v655_v52 = vsel %vm6545_vm2, %v650_v45, %v654_v40  ;;  %v669_v53 = vsel %vm6545_vm2, %v664_v46, %v668_v41  ;;  %v6241_v47 = vld [vmem:[#allocation3 + $0x228] sm:$0xff]   ;;  %s4568_s16 = sshll.u32 %s289_s20, 4  ;;  %s5135_s21 = sshll.u32 %s6408_s28, 10  ;;  %s7136_s16 = int_to_ptr.vmem [resolvable:$true] %s4568_s16 }
  0x48   : > { %v4715_v58 = vcombine.low %v655_v52, %v669_v53  ;;  %v743_v40 = vrot.slane %v741_v28, 4  ;;  %v746_v41 = vrot.slane %v744_v29, 5  ;;  %s7141_s22 = scalar_lea.hbm %s7193_s7, %s5135_s21  ;;  %s7145_s28 = scalar_lea.sflag [#allocation5], %s287_s18 }
  0x49   : > { %p7212_p9 = scmp.ne.s32.totalorder %s7197_s11, 0  ;;  %s6344_s23 = smov [#allocation6]  }
  0x4a   : > { %5375 = vmatpush3.bf16.msra.mxu0 %v6049_v6  ;;  %v713_v6 = vshrl.u32 %v633_v0, 16  ;;  %v747_v49 = vor.u32 %v746_v41, %v743_v40  ;;  %v4807_v40 = vld [vmem:[%s6483_s8 + $0xb0] sm:$0xf]  ;;  %v6104_v41 = vld [vmem:[%s6483_s8 + $0xf8] ss:$8 sps:$4 sm:$0xff]   ;;  %s6276_s29 = sshll.u32 %s6344_s23, 4  ;;  %s6277_s29 = int_to_ptr.vmem [resolvable:$false] %s6276_s29 }
  0x4b   : > { %5376 = vmatprep.subr.bf16.mxu0 %v6050_v7  ;;  %s6278_s9 = scalar_lea.vmem %s6277_s29, 2048  ;;  %p6279_p2 = scmp.lt.s32.totalorder %s7136_s16, %s6277_s29 }
  0x4e   : > { %5377 = vmatpush3.bf16.msra.mxu0 %v6050_v7  ;;  %v716_v7 = vshll.u32 %v633_v0, 16  ;;  %v6079_v0 = vld [vmem:[%s7187_s1 + $0xd8] sm:$0xff]  }
  0x4f   : > { %5378 = vmatprep.subr.bf16.mxu0 %v6051_v8 }
  0x50   : > { %v718_v19 = vrot.slane %v716_v7, 5  ;;  %v6085_v7 = vld [vmem:[%s7187_s1 + $0x100] sm:$0xff]  }
  0x52   : > { %5379 = vmatpush3.bf16.msra.mxu0 %v6051_v8  ;;  %v634_v8 = vld [vmem:[%s6483_s8 + $0x2c] sm:$0x1] }
  0x53   : > { %5388 = vmatprep.subr.bf16.mxu0 %v6053_v9  ;;  %v722_v20 = vshll.u32 %v634_v8, 16  ;;  %v6086_v8 = vld [vmem:[%s6483_s8 + $0xa0] ss:$8 sps:$4 sm:$0xff]  }
  0x55   : > { %5381 = vmatmul.mubr.bf16.vlgmr.msra.gmra.mrb[0].mxu0 %v6054_v10  ;;  %v694_v10 = vshll.u32 %v630_v63, 16  ;;  %v724_v34 = vrot.slane %v722_v20, 5  ;;  %v6078_v63 = vld [vmem:[%s7187_s1 + $0xd0] sm:$0xff]  }
  0x56   : > { %5389 = vmatpush3.bf16.msra.mxu0 %v6053_v9  ;;  %5384 = vmatprep.mubr.bf16.mxu0 %v6060_v11  ;;  %v680_v9 = vshll.u32 %v628_v62, 16  ;;  %v635_v11 = vld [vmem:[%s6483_s8 + $0x30] sm:$0xf] }
  0x57   : > { %5390 = vmatprep.subr.bf16.mxu0 %v6055_v12  ;;  %v727_v22 = vshrl.u32 %v635_v11, 16  ;;  %v696_v25 = vrot.slane %v694_v10, 5  ;;  %v6087_v10 = vld [vmem:[%s7187_s1 + $0x108] sm:$0xff]  }
  0x58   : > { %v682_v24 = vrot.slane %v680_v9, 5  ;;  %v6092_v9 = vld [vmem:[%s6483_s8 + $0xb0] ss:$8 sps:$4 sm:$0xff]  }
  0x5a   : > { %5391 = vmatpush3.bf16.msra.mxu0 %v6055_v12  ;;  %v6071_v12 = vld [vmem:[%s7187_s1 + $0xa8] sm:$0xff]  }
  0x5b   : > { %5392 = vmatprep.subr.bf16.mxu0 %v6056_v13 }
  0x5d   : > { %5385 = vmatmul.mubr.bf16.gmra.mrb[4].mxu0 %v6062_v14  ;;  %v691_v14 = vor.u32 %v690_v2, %v687_v60  ;;  %v6077_v60 = vld [vmem:[%s7187_s1 + $0xc8] sm:$0xff]   ;;  %v6084_v2 = vld [vmem:[%s6483_s8 + $0x90] ss:$8 sps:$4 sm:$0xff]  }
  0x5e   : > { %5393 = vmatpush3.bf16.msra.mxu0 %v6056_v13  ;;  %5404 = vmatprep.mubr.bf16.mxu0 %v6064_v15  ;;  %v677_v13 = vor.u32 %v676_v59, %v673_v56  ;;  %v701_v15 = vrot.slane %v699_v3, 4  ;;  %v6080_v3 = vld [vmem:[%s7187_s1 + $0xe0] sm:$0xff]  }
  0x5f   : > { %5394 = vmatprep.subr.bf16.mxu0 %v6057_v16 }
  0x60   : > { %v678_v26 = vrot.slane %v677_v13, 4  ;;  %v6089_v13 = vld [vmem:[%s7187_s1 + $0x118] sm:$0xff]  }
  0x62   : > { %5395 = vmatpush3.bf16.msra.mxu0 %v6057_v16  ;;  %v708_v16 = vshll.u32 %v632_v1, 16  ;;  %v683_v44 = vsel %vm6545_vm2, %v678_v26, %v682_v24  ;;  %v4800_v24 = vld [vmem:[%s6483_s8 + $0x94] sm:$0x1]  ;;  %v4802_v26 = vld [vmem:[%s6483_s8 + $0x9c] sm:$0x1] }
  0x63   : > { %5396 = vmatprep.subr.bf16.mxu0 %v6058_v17 }
  0x64   : > { %v710_v32 = vrot.slane %v708_v16, 5  ;;  %v4799_v16 = vld [vmem:[%s6483_s8 + $0x90] sm:$0xf] }
  0x65   : > { %v1270_v20 = vshll.u32 %v4799_v16, 16 }
  0x66   : > { %5397 = vmatpush3.bf16.msra.mxu0 %v6058_v17  ;;  %v704_v17 = vrot.slane %v702_v5, 5  ;;  %v6082_v5 = vld [vmem:[%s7187_s1 + $0xf0] sm:$0xff]  }
  0x67   : > { %5398 = vmatprep.subr.bf16.mxu0 %v6059_v18  ;;  %v1272_v28 = vrot.slane %v1270_v20, 5  ;;  %v4814_v20 = vld [vmem:[%s6483_s8 + $0xcc] sm:$0x1] }
  0x68   : > { %v705_v31 = vor.u32 %v704_v17, %v701_v15  ;;  %v6090_v15 = vld [vmem:[%s7187_s1 + $0x120] sm:$0xff]   ;;  %v6091_v17 = vld [vmem:[%s7187_s1 + $0x128] sm:$0xff]  }
  0x6a   : > { %5399 = vmatpush3.bf16.msra.mxu0 %v6059_v18  ;;  %v715_v18 = vrot.slane %v713_v6, 4  ;;  %v6083_v6 = vld [vmem:[%s7187_s1 + $0xf8] sm:$0xff]  }
  0x6b   : > { %5400 = vmatprep.subr.bf16.mxu0 %v6061_v23 }
  0x6c   : > { %v719_v33 = vor.u32 %v718_v19, %v715_v18  ;;  %v4801_v18 = vld [vmem:[%s6483_s8 + $0x98] sm:$0xf]  ;;  %v1267_v19 = vshrl.u32 %v4799_v16, 16 }
  0x6e   : > { %5401 = vmatpush3.bf16.msra.mxu0 %v6061_v23  ;;  %v730_v23 = vshll.u32 %v635_v11, 16  ;;  %v720_v43 = vrot.slane %v719_v33, 4  ;;  %v6088_v11 = vld [vmem:[%s7187_s1 + $0x110] sm:$0xff]   ;;  %v6097_v33 = vld [vmem:[%s7187_s1 + $0x140] sm:$0xff]  }
  0x6f   : > { %5402 = vmatprep.subr.bf16.mxu0 %v6063_v27 }
  0x70   : > { %v732_v37 = vrot.slane %v730_v23, 5  ;;  %v725_v53 = vsel %vm6545_vm2, %v720_v43, %v724_v34  ;;  %v1284_v23 = vshll.u32 %v4801_v18, 16  ;;  %v1290_v34 = vshll.u32 %v4802_v26, 16 }
  0x72   : > { %5403 = vmatpush3.bf16.msra.mxu0 %v6063_v27  ;;  %v692_v27 = vrot.slane %v691_v14, 4  ;;  %v6096_v14 = vld [vmem:[%s6483_s8 + $0xd8] ss:$8 sps:$4 sm:$0xff]  }
  0x73   : > { %5412 = vmatprep.subr.bf16.mxu0 %v6065_v35 }
  0x74   : > { %v697_v46 = vsel %vm6545_vm2, %v692_v27, %v696_v25  ;;  %v6095_v25 = vld [vmem:[%s7187_s1 + $0x138] sm:$0xff]   ;;  %v1269_v27 = vrot.slane %v1267_v19, 4  ;;  %v4812_v19 = vld [vmem:[%s6483_s8 + $0xc4] sm:$0x1] }
  0x75   : > { %5405 = vmatmul.mubr.bf16.vlgmr.msra.gmra.mrb[0].mxu0 %v6066_v36  ;;  %v729_v36 = vrot.slane %v727_v22, 4  ;;  %v1281_v22 = vshrl.u32 %v4801_v18, 16 }
  0x76   : > { %5413 = vmatpush3.bf16.msra.mxu0 %v6065_v35  ;;  %5408 = vmatprep.mubr.bf16.mxu0 %v6072_v39  ;;  %v636_v35 = vld [vmem:[%s6483_s8 + $0x34] sm:$0x1]  ;;  %v638_v39 = vld [vmem:[%s6483_s8 + $0x3c] sm:$0x1] }
  0x77   : > { %5414 = vmatprep.subr.bf16.mxu0 %v6067_v42  ;;  %v736_v45 = vshll.u32 %v636_v35, 16  ;;  %v733_v48 = vor.u32 %v732_v37, %v729_v36  ;;  %v750_v50 = vshll.u32 %v638_v39, 16  ;;  %v1283_v29 = vrot.slane %v1281_v22, 4  ;;  %v4805_v35 = vld [vmem:[%s6483_s8 + $0xa8] sm:$0xf] }
  0x78   : > { %v6098_v36 = vld [vmem:[%s6483_s8 + $0xe8] ss:$8 sps:$4 sm:$0xff]   ;;  %v1273_v37 = vor.u32 %v1272_v28, %v1269_v27  ;;  %v6658_v39 = vld [vmem:[%s6483_s8 + $0xa4] sm:$0x1] }
  0x79   : > { %v734_v57 = vrot.slane %v733_v48, 4  ;;  %v752_v59 = vrot.slane %v750_v50, 5  ;;  %v1309_v48 = vshrl.u32 %v4805_v35, 16  ;;  %v4811_v50 = vld [vmem:[%s6483_s8 + $0xc0] sm:$0xf] }
  0x7a   : > { %5415 = vmatpush3.bf16.msra.mxu0 %v6067_v42  ;;  %v706_v42 = vrot.slane %v705_v31, 4  ;;  %v1276_v31 = vshll.u32 %v4800_v24, 16 }
  0x7b   : > { %5416 = vmatprep.subr.bf16.mxu0 %v6068_v51 }
  0x7c   : > { %v711_v52 = vsel %vm6545_vm2, %v706_v42, %v710_v32  ;;  %v4803_v32 = vld [vmem:[%s6483_s8 + $0xa0] sm:$0xf]  ;;  %v1278_v42 = vrot.slane %v1276_v31, 5  ;;  %v1360_v31 = vshll.u32 %v4812_v19, 16  ;;  %v6124_v19 = vld [vmem:[%s6483_s8 + $0x28] ss:$8 sps:$4 sm:$0xff]  }
  0x7d   : > { %5409 = vmatmul.mubr.bf16.gmra.mrb[4].mxu0 %v6074_v54  ;;  %v4716_v54 = vcombine.low %v683_v44, %v697_v46  ;;  %v4717_v56 = vcombine.low %v711_v52, %v725_v53  ;;  %v1295_v43 = vshrl.u32 %v4803_v32, 16  ;;  %v1298_v44 = vshll.u32 %v4803_v32, 16  ;;  %v6099_v46 = vld [vmem:[%s7187_s1 + $0x148] sm:$0xff]  }
  0x7e   : > { %5417 = vmatpush3.bf16.msra.mxu0 %v6068_v51  ;;  %5428 = vmatprep.mubr.bf16.mxu0 %v4715_v58  ;;  %v6076_v51 = vld [vmem:[%s7187_s1 + $0xc0] sm:$0xff]   ;;  %v748_v58 = vrot.slane %v747_v49, 4  ;;  %v1312_v49 = vshll.u32 %v4805_v35, 16  ;;  %v1292_v52 = vrot.slane %v1290_v34, 5  ;;  %v1304_v53 = vshll.u32 %v6658_v39, 16  ;;  %v6141_v35 = vld [vmem:[%s7191_s5 + $0x8] sm:$0xff]  }
  0x7f   : > { %5418 = vmatprep.subr.bf16.mxu0 %v6069_v55  ;;  %v6140_v34 = vld [vmem:[%s7191_s5] sm:$0xff]  }
  0x80   : > { %v753_v62 = vsel %vm6545_vm2, %v748_v58, %v752_v59  ;;  %5580 = vmatprep.subr.bf16.mxu1 %v6140_v34 }
  0x81   : > { %5581 = vmatpush3.bf16.msra.mxu1 %v6140_v34  ;;  %v6127_v34 = vld [vmem:[%s7187_s1 + $0x1f8] sm:$0xff]  }
  0x82   : > { %5419 = vmatpush3.bf16.msra.mxu0 %v6069_v55  ;;  %v738_v55 = vrot.slane %v736_v45, 5  ;;  %v4809_v45 = vld [vmem:[%s6483_s8 + $0xb8] sm:$0xf]  ;;  %5582 = vmatprep.subr.bf16.mxu1 %v6141_v35 }
  0x83   : > { %5420 = vmatprep.subr.bf16.mxu0 %v6070_v4  ;;  %v1337_v58 = vshrl.u32 %v4809_v45, 16  ;;  %v1340_v59 = vshll.u32 %v4809_v45, 16  ;;  %v6148_v45 = vld [vmem:[%s6483_s8 + $0xd8] ss:$8 sps:$4 sm:$0xff]  }
  0x84   : > { %v739_v61 = vsel %vm6545_vm2, %v734_v57, %v738_v55  ;;  %v1326_v55 = vshll.u32 %v4807_v40, 16  ;;  %5596 = vmatprep.mubr.bf16.mxu1 %v6148_v45 }
  0x85   : > { %v4718_v1 = vcombine.low %v739_v61, %v753_v62  ;;  %v1354_v61 = vshll.u32 %v4811_v50, 16  ;;  %5583 = vmatpush3.bf16.msra.mxu1 %v6141_v35 }
  0x86   : > { %5421 = vmatpush3.bf16.msra.mxu0 %v6070_v4  ;;  %v6081_v4 = vld [vmem:[%s7187_s1 + $0xe8] sm:$0xff]  }
  0x87   : > { %5422 = vmatprep.subr.bf16.mxu0 %v6071_v12  ;;  %v1356_v16 = vrot.slane %v1354_v61, 5 }
  0x8a   : > { %5423 = vmatpush3.bf16.msra.mxu0 %v6071_v12  ;;  %v6094_v12 = vld [vmem:[%s6483_s8 + $0xc0] ss:$8 sps:$4 sm:$0xff]  }
  0x8b   : > { %5424 = vmatprep.subr.bf16.mxu0 %v6073_v30 }
  0x8e   : > { %5425 = vmatpush3.bf16.msra.mxu0 %v6073_v30  ;;  %v1286_v30 = vrot.slane %v1284_v23, 5 }
  0x8f   : > { %5426 = vmatprep.subr.bf16.mxu0 %v6075_v38 }
  0x92   : > { %5427 = vmatpush3.bf16.msra.mxu0 %v6075_v38  ;;  %v1287_v38 = vor.u32 %v1286_v30, %v1283_v29 }
  0x93   : > { %5436 = vmatprep.subr.bf16.mxu0 %v6076_v51 }
  0x94   : > { %v1288_v57 = vrot.slane %v1287_v38, 4  ;;  %v1306_v38 = vrot.slane %v1304_v53, 5  ;;  %v6143_v53 = vld [vmem:[%s7191_s5 + $0x18] sm:$0xff]  }
  0x95   : > { %5429 = vmatmul.mubr.bf16.vlgmr.msra.gmra.mrb[0].mxu0 %v4716_v54  ;;  %v1323_v54 = vshrl.u32 %v4807_v40, 16 }
  0x96   : > { %5437 = vmatpush3.bf16.msra.mxu0 %v6076_v51  ;;  %5432 = vmatprep.mubr.bf16.mxu0 %v4717_v56  ;;  %v4813_v51 = vld [vmem:[%s6483_s8 + $0xc8] sm:$0xf]  ;;  %v1274_v56 = vrot.slane %v1273_v37, 4 }
  0x97   : > { %5438 = vmatprep.subr.bf16.mxu0 %v6077_v60  ;;  %v1365_v62 = vshrl.u32 %v4813_v51, 16 }
  0x9a   : > { %5439 = vmatpush3.bf16.msra.mxu0 %v6077_v60  ;;  %v1351_v60 = vshrl.u32 %v4811_v50, 16 }
  0x9b   : > { %5440 = vmatprep.subr.bf16.mxu0 %v6078_v63 }
  0x9d   : > { %5433 = vmatmul.mubr.bf16.gmra.mrb[4].mxu0 %v4718_v1  ;;  %v4806_v1 = vld [vmem:[%s6483_s8 + $0xac] sm:$0x1] }
  0x9e   : > { %5441 = vmatpush3.bf16.msra.mxu0 %v6078_v63  ;;  %5452 = vmatprep.mubr.bf16.mxu0 %v6084_v2  ;;  %v1368_v63 = vshll.u32 %v4813_v51, 16  ;;  %v1297_v2 = vrot.slane %v1295_v43, 4  ;;  %v1318_v24 = vshll.u32 %v4806_v1, 16  ;;  %v6142_v51 = vld [vmem:[%s7191_s5 + $0x10] sm:$0xff]   ;;  %v6109_v1 = vld [vmem:[%s7187_s1 + $0x188] sm:$0xff]  }
  0x9f   : > { %5442 = vmatprep.subr.bf16.mxu0 %v6079_v0  ;;  %5584 = vmatprep.subr.bf16.mxu1 %v6142_v51 }
  0xa0   : > { %v1370_v18 = vrot.slane %v1368_v63, 5  ;;  %v1320_v40 = vrot.slane %v1318_v24, 5  ;;  %5585 = vmatpush3.bf16.msra.mxu1 %v6142_v51  ;;  %v6146_v63 = vld [vmem:[%s7191_s5 + $0x30] sm:$0xff]   ;;  %v6121_v24 = vld [vmem:[%s7187_s1 + $0x1d8] sm:$0xff]  }
  0xa1   : > { %5586 = vmatprep.subr.bf16.mxu1 %v6143_v53 }
  0xa2   : > { %5443 = vmatpush3.bf16.msra.mxu0 %v6079_v0  ;;  %v6100_v0 = vld [vmem:[%s7187_s1 + $0x150] sm:$0xff]  }
  0xa3   : > { %5444 = vmatprep.subr.bf16.mxu0 %v6080_v3 }
  0xa4   : > { %5587 = vmatpush3.bf16.msra.mxu1 %v6143_v53 }
  0xa6   : > { %5445 = vmatpush3.bf16.msra.mxu0 %v6080_v3  ;;  %v1300_v3 = vrot.slane %v1298_v44, 5 }
  0xa7   : > { %5446 = vmatprep.subr.bf16.mxu0 %v6081_v4 }
  0xa8   : > { %v1301_v22 = vor.u32 %v1300_v3, %v1297_v2  ;;  %v6147_v3 = vld [vmem:[%s7191_s5 + $0x38] sm:$0xff]  }
  0xaa   : > { %5447 = vmatpush3.bf16.msra.mxu0 %v6081_v4  ;;  %v1311_v4 = vrot.slane %v1309_v48, 4  ;;  %v1302_v37 = vrot.slane %v1301_v22, 4  ;;  %v1362_v48 = vrot.slane %v1360_v31, 5  ;;  %v6126_v22 = vld [vmem:[%s6483_s8 + $0x38] ss:$8 sps:$4 sm:$0xff]  }
  0xab   : > { %5448 = vmatprep.subr.bf16.mxu0 %v6082_v5 }
  0xae   : > { %5449 = vmatpush3.bf16.msra.mxu0 %v6082_v5  ;;  %v1314_v5 = vrot.slane %v1312_v49, 5 }
  0xaf   : > { %5450 = vmatprep.subr.bf16.mxu0 %v6083_v6 }
  0xb0   : > { %v1315_v23 = vor.u32 %v1314_v5, %v1311_v4  ;;  %v6110_v4 = vld [vmem:[%s7187_s1 + $0x190] sm:$0xff]  }
  0xb2   : > { %5451 = vmatpush3.bf16.msra.mxu0 %v6083_v6  ;;  %v4808_v6 = vld [vmem:[%s6483_s8 + $0xb4] sm:$0x1]  ;;  %v1316_v39 = vrot.slane %v1315_v23, 4  ;;  %v6128_v23 = vld [vmem:[%s6483_s8 + $0x50] ss:$8 sps:$4 sm:$0xff]  }
  0xb3   : > { %5460 = vmatprep.subr.bf16.mxu0 %v6085_v7  ;;  %v1332_v27 = vshll.u32 %v4808_v6, 16 }
  0xb5   : > { %5453 = vmatmul.mubr.bf16.vlgmr.msra.gmra.mrb[0].mxu0 %v6086_v8  ;;  %v1325_v8 = vrot.slane %v1323_v54, 4  ;;  %v6105_v54 = vld [vmem:[%s7187_s1 + $0x170] sm:$0xff]  }
  0xb6   : > { %5461 = vmatpush3.bf16.msra.mxu0 %v6085_v7  ;;  %5456 = vmatprep.mubr.bf16.mxu0 %v6092_v9  ;;  %v4810_v7 = vld [vmem:[%s6483_s8 + $0xbc] sm:$0x1]  ;;  %v1328_v9 = vrot.slane %v1326_v55, 5  ;;  %v6144_v55 = vld [vmem:[%s7191_s5 + $0x20] sm:$0xff]  }
  0xb7   : > { %5462 = vmatprep.subr.bf16.mxu0 %v6087_v10  ;;  %v1346_v29 = vshll.u32 %v4810_v7, 16  ;;  %5588 = vmatprep.subr.bf16.mxu1 %v6144_v55 }
  0xb8   : > { %v1329_v26 = vor.u32 %v1328_v9, %v1325_v8  ;;  %5589 = vmatpush3.bf16.msra.mxu1 %v6144_v55  ;;  %v6149_v8 = vld [vmem:[#allocation3] sm:$0xff]  }
  0xb9   : > { %v1348_v44 = vrot.slane %v1346_v29, 5  ;;  %v6116_v9 = vld [vmem:[%s6483_s8 + $0x8] ss:$8 sps:$4 sm:$0xff]  }
  0xba   : > { %5463 = vmatpush3.bf16.msra.mxu0 %v6087_v10  ;;  %v6106_v10 = vld [vmem:[%s6483_s8 + $0x108] ss:$8 sps:$4 sm:$0xff]  }
  0xbb   : > { %5464 = vmatprep.subr.bf16.mxu0 %v6088_v11  ;;  %v6125_v29 = vld [vmem:[%s7187_s1 + $0x1f0] sm:$0xff]  }
  0xbd   : > { %5457 = vmatmul.mubr.bf16.gmra.mrb[4].mxu0 %v6094_v12  ;;  %v1293_v12 = vsel %vm6545_vm2, %v1288_v57, %v1292_v52  ;;  %v6103_v52 = vld [vmem:[%s7187_s1 + $0x168] sm:$0xff]  }
  0xbe   : > { %5465 = vmatpush3.bf16.msra.mxu0 %v6088_v11  ;;  %5476 = vmatprep.mubr.bf16.mxu0 %v6096_v14  ;;  %v1279_v11 = vsel %vm6545_vm2, %v1274_v56, %v1278_v42  ;;  %v1342_v14 = vrot.slane %v1340_v59, 5  ;;  %v1334_v42 = vrot.slane %v1332_v27, 5  ;;  %v6107_v56 = vld [vmem:[%s7187_s1 + $0x178] sm:$0xff]   ;;  %v6145_v57 = vld [vmem:[%s7191_s5 + $0x28] sm:$0xff]   ;;  %v1307_v59 = vsel %vm6545_vm2, %v1302_v37, %v1306_v38 }
  0xbf   : > { %5466 = vmatprep.subr.bf16.mxu0 %v6089_v13  ;;  %5590 = vmatprep.subr.bf16.mxu1 %v6145_v57  ;;  %v4915_v27 = vld [vmem:[%s6483_s8 + $0x8] sm:$0xf] }
  0xc0   : > { %5591 = vmatpush3.bf16.msra.mxu1 %v6145_v57  ;;  %v1894_v31 = vshll.u32 %v4915_v27, 16  ;;  %v6137_v57 = vld [vmem:[%s6483_s8 + $0x80] ss:$8 sps:$4 sm:$0xff]  }
  0xc1   : > { %5592 = vmatprep.subr.bf16.mxu1 %v6146_v63 }
  0xc2   : > { %5467 = vmatpush3.bf16.msra.mxu0 %v6089_v13  ;;  %v1339_v13 = vrot.slane %v1337_v58, 4  ;;  %v6108_v58 = vld [vmem:[%s7187_s1 + $0x180] sm:$0xff]  }
  0xc3   : > { %5468 = vmatprep.subr.bf16.mxu0 %v6090_v15 }
  0xc4   : > { %v1343_v28 = vor.u32 %v1342_v14, %v1339_v13  ;;  %5593 = vmatpush3.bf16.msra.mxu1 %v6146_v63  ;;  %v6112_v13 = vld [vmem:[%s7187_s1 + $0x1a0] sm:$0xff]   ;;  %v6113_v14 = vld [vmem:[%s7187_s1 + $0x1a8] sm:$0xff]   ;;  %v4925_v63 = vld [vmem:[%s6483_s8 + $0x30] sm:$0xf] }
  0xc5   : > { %5594 = vmatprep.subr.bf16.mxu1 %v6147_v3 }
  0xc6   : > { %5469 = vmatpush3.bf16.msra.mxu0 %v6090_v15  ;;  %v1353_v15 = vrot.slane %v1351_v60, 4  ;;  %v1344_v43 = vrot.slane %v1343_v28, 4  ;;  %v1321_v60 = vsel %vm6545_vm2, %v1316_v39, %v1320_v40  ;;  %v4917_v28 = vld [vmem:[%s6483_s8 + $0x10] sm:$0xf]  ;;  %v4916_v39 = vld [vmem:[%s6483_s8 + $0xc] sm:$0x1] }
  0xc7   : > { %5470 = vmatprep.subr.bf16.mxu0 %v6091_v17  ;;  %v4918_v40 = vld [vmem:[%s6483_s8 + $0x14] sm:$0x1] }
  0xc8   : > { %v1357_v30 = vor.u32 %v1356_v16, %v1353_v15  ;;  %5595 = vmatpush3.bf16.msra.mxu1 %v6147_v3  ;;  %v6114_v15 = vld [vmem:[%s7187_s1 + $0x1b0] sm:$0xff]   ;;  %v6115_v16 = vld [vmem:[%s7187_s1 + $0x1b8] sm:$0xff]   ;;  %v1914_v45 = vshll.u32 %v4918_v40, 16 }
  0xc9   : > { %5604 = vmatprep.subr.bf16.mxu1 %v6149_v8 }
  0xca   : > { %5471 = vmatpush3.bf16.msra.mxu0 %v6091_v17  ;;  %v1367_v17 = vrot.slane %v1365_v62, 4  ;;  %v1349_v62 = vsel %vm6545_vm2, %v1344_v43, %v1348_v44  ;;  %v1900_v43 = vshll.u32 %v4916_v39, 16  ;;  %v1916_v53 = vrot.slane %v1914_v45, 5 }
  0xcb   : > { %5472 = vmatprep.subr.bf16.mxu0 %v6093_v21 }
  0xcc   : > { %v1371_v32 = vor.u32 %v1370_v18, %v1367_v17  ;;  %v6117_v17 = vld [vmem:[%s7187_s1 + $0x1c0] sm:$0xff]   ;;  %v1902_v51 = vrot.slane %v1900_v43, 5 }
  0xcd   : > { %v6118_v18 = vld [vmem:[%s6483_s8 + $0x18] ss:$8 sps:$4 sm:$0xff]  }
  0xce   : > { %5473 = vmatpush3.bf16.msra.mxu0 %v6093_v21  ;;  %v4831_v21 = vcombine.low %v1279_v11, %v1293_v12  ;;  %v1372_v49 = vrot.slane %v1371_v32, 4  ;;  %v6150_v11 = vld [vmem:[%s6483_s8 + $0xe8] ss:$8 sps:$4 sm:$0xff]   ;;  %v6151_v12 = vld [vmem:[#allocation3 + $0x8] sm:$0xff]   ;;  %v1905_v32 = vshrl.u32 %v4917_v28, 16 }
  0xcf   : > { %5474 = vmatprep.subr.bf16.mxu0 %v6095_v25  ;;  %5597 = vmatmul.mubr.bf16.vlgmr.msra.gmra.mrb[0].mxu1 %v6150_v11 }
  0xd0   : > { %5605 = vmatpush3.bf16.msra.mxu1 %v6149_v8  ;;  %v1907_v37 = vrot.slane %v1905_v32, 4  ;;  %v1964_v8 = vshll.u32 %v4925_v63, 16  ;;  %v6138_v32 = vld [vmem:[%s7187_s1 + $0x230] sm:$0xff]  }
  0xd1   : > { %5606 = vmatprep.subr.bf16.mxu1 %v6151_v12 }
  0xd2   : > { %5475 = vmatpush3.bf16.msra.mxu0 %v6095_v25  ;;  %v6101_v25 = vld [vmem:[%s7187_s1 + $0x158] sm:$0xff]  }
  0xd3   : > { %5484 = vmatprep.subr.bf16.mxu0 %v6097_v33 }
  0xd4   : > { %5607 = vmatpush3.bf16.msra.mxu1 %v6151_v12 }
  0xd5   : > { %5477 = vmatmul.mubr.bf16.vlgmr.msra.gmra.mrb[0].mxu0 %v6098_v36  ;;  %v6102_v36 = vld [vmem:[%s7187_s1 + $0x160] sm:$0xff]  }
  0xd6   : > { %5485 = vmatpush3.bf16.msra.mxu0 %v6097_v33  ;;  %5480 = vmatprep.mubr.bf16.mxu0 %v6104_v41  ;;  %v1374_v33 = vshll.u32 %v4814_v20, 16  ;;  %v1330_v41 = vrot.slane %v1329_v26, 4  ;;  %v6119_v20 = vld [vmem:[%s7187_s1 + $0x1c8] sm:$0xff]  }
  0xd7   : > { %5486 = vmatprep.subr.bf16.mxu0 %v6099_v46  ;;  %v6123_v26 = vld [vmem:[%s7187_s1 + $0x1e8] sm:$0xff]  }
  0xd8   : > { %v1376_v50 = vrot.slane %v1374_v33, 5  ;;  %v1335_v61 = vsel %vm6545_vm2, %v1330_v41, %v1334_v42  ;;  %v1908_v33 = vshll.u32 %v4917_v28, 16  ;;  %v6129_v41 = vld [vmem:[%s7187_s1 + $0x200] sm:$0xff]  }
  0xd9   : > { %v4833_v2 = vcombine.low %v1335_v61, %v1349_v62  ;;  %v6133_v61 = vld [vmem:[%s7187_s1 + $0x218] sm:$0xff]   ;;  %v4923_v62 = vld [vmem:[%s6483_s8 + $0x28] sm:$0xf] }
  0xda   : > { %5487 = vmatpush3.bf16.msra.mxu0 %v6099_v46  ;;  %v1358_v46 = vrot.slane %v1357_v30, 4  ;;  %v1377_v6 = vsel %vm6545_vm2, %v1372_v49, %v1376_v50  ;;  %v1891_v30 = vshrl.u32 %v4915_v27, 16  ;;  %v1910_v38 = vrot.slane %v1908_v33, 5  ;;  %v6131_v49 = vld [vmem:[%s7187_s1 + $0x208] sm:$0xff]  }
  0xdb   : > { %5488 = vmatprep.subr.bf16.mxu0 %v6100_v0 }
  0xdc   : > { %v1363_v5 = vsel %vm6545_vm2, %v1358_v46, %v1362_v48  ;;  %v1893_v35 = vrot.slane %v1891_v30, 4  ;;  %v1911_v44 = vor.u32 %v1910_v38, %v1907_v37  ;;  %v6130_v46 = vld [vmem:[%s6483_s8 + $0x60] ss:$8 sps:$4 sm:$0xff]   ;;  %v6136_v48 = vld [vmem:[%s6483_s8 + $0x70] ss:$8 sps:$4 sm:$0xff]  }
  0xdd   : > { %5481 = vmatmul.mubr.bf16.gmra.mrb[4].mxu0 %v6106_v10  ;;  %v4834_v7 = vcombine.low %v1363_v5, %v1377_v6  ;;  %v6111_v10 = vld [vmem:[%s7187_s1 + $0x198] sm:$0xff]   ;;  %v1947_v5 = vshrl.u32 %v4923_v62, 16  ;;  %v1950_v6 = vshll.u32 %v4923_v62, 16 }
  0xde   : > { %5489 = vmatpush3.bf16.msra.mxu0 %v6100_v0  ;;  %5500 = vmatprep.mubr.bf16.mxu0 %v4831_v21  ;;  %v4832_v0 = vcombine.low %v1307_v59, %v1321_v60  ;;  %v6120_v21 = vld [vmem:[%s7187_s1 + $0x1d0] sm:$0xff]   ;;  %v4919_v59 = vld [vmem:[%s6483_s8 + $0x18] sm:$0xf]  ;;  %v4921_v60 = vld [vmem:[%s6483_s8 + $0x20] sm:$0xf] }
  0xdf   : > { %5490 = vmatprep.subr.bf16.mxu0 %v6101_v25  ;;  %v1936_v3 = vshll.u32 %v4921_v60, 16  ;;  %v6139_v37 = vld [vmem:[%s7187_s1 + $0x238] sm:$0xff]  }
  0xe2   : > { %5491 = vmatpush3.bf16.msra.mxu0 %v6101_v25  ;;  %v6122_v25 = vld [vmem:[%s7187_s1 + $0x1e0] sm:$0xff]  }
  0xe3   : > { %5492 = vmatprep.subr.bf16.mxu0 %v6102_v36 }
  0xe6   : > { %5493 = vmatpush3.bf16.msra.mxu0 %v6102_v36  ;;  %v1896_v36 = vrot.slane %v1894_v31, 5 }
  0xe7   : > { %5494 = vmatprep.subr.bf16.mxu0 %v6103_v52 }
  0xe8   : > { %v1897_v42 = vor.u32 %v1896_v36, %v1893_v35 }
  0xea   : > { %5495 = vmatpush3.bf16.msra.mxu0 %v6103_v52  ;;  %v1898_v50 = vrot.slane %v1897_v42, 4  ;;  %v1912_v52 = vrot.slane %v1911_v44, 4  ;;  %v4928_v42 = vld [vmem:[%s6483_s8 + $0x3c] sm:$0x1] }
  0xeb   : > { %5496 = vmatprep.subr.bf16.mxu0 %v6105_v54 }
  0xec   : > { %v1903_v55 = vsel %vm6545_vm2, %v1898_v50, %v1902_v51 }
  0xee   : > { %5497 = vmatpush3.bf16.msra.mxu0 %v6105_v54  ;;  %v6132_v54 = vld [vmem:[%s7187_s1 + $0x210] sm:$0xff]  }
  0xef   : > { %5498 = vmatprep.subr.bf16.mxu0 %v6107_v56 }
  0xf2   : > { %5499 = vmatpush3.bf16.msra.mxu0 %v6107_v56  ;;  %v1917_v56 = vsel %vm6545_vm2, %v1912_v52, %v1916_v53  ;;  %v4930_v52 = vld [vmem:[%s6483_s8 + $0x44] sm:$0x1] }
  0xf3   : > { %5508 = vmatprep.subr.bf16.mxu0 %v6108_v58 }
  0xf5   : > { %5501 = vmatmul.mubr.bf16.vlgmr.msra.gmra.mrb[0].mxu0 %v4832_v0  ;;  %v1919_v0 = vshrl.u32 %v4919_v59, 16 }
  0xf6   : > { %5509 = vmatpush3.bf16.msra.mxu0 %v6108_v58  ;;  %5504 = vmatprep.mubr.bf16.mxu0 %v4833_v2  ;;  %v4947_v58 = vcombine.low %v1903_v55, %v1917_v56  ;;  %v1933_v2 = vshrl.u32 %v4921_v60, 16 }
  0xf7   : > { %5510 = vmatprep.subr.bf16.mxu0 %v6109_v1 }
  0xf8   : > { %v1935_v12 = vrot.slane %v1933_v2, 4 }
  0xfa   : > { %5511 = vmatpush3.bf16.msra.mxu0 %v6109_v1  ;;  %v1922_v1 = vshll.u32 %v4919_v59, 16 }
  0xfb   : > { %5512 = vmatprep.subr.bf16.mxu0 %v6110_v4 }
  0xfc   : > { %v1924_v11 = vrot.slane %v1922_v1, 5 }
  0xfd   : > { %5505 = vmatmul.mubr.bf16.gmra.mrb[4].mxu0 %v4834_v7  ;;  %v1961_v7 = vshrl.u32 %v4925_v63, 16 }
  0xfe   : > { %5513 = vmatpush3.bf16.msra.mxu0 %v6110_v4  ;;  %5524 = vmatprep.mubr.bf16.mxu0 %v6116_v9  ;;  %v6134_v4 = vld [vmem:[%s7187_s1 + $0x220] sm:$0xff]   ;;  %v6135_v9 = vld [vmem:[%s7187_s1 + $0x228] sm:$0xff]  }
  0xff   : > { %5514 = vmatprep.subr.bf16.mxu0 %v6111_v10 }
 0x102   : > { %5515 = vmatpush3.bf16.msra.mxu0 %v6111_v10  ;;  %v1921_v10 = vrot.slane %v1919_v0, 4 }
 0x103   : > { %5516 = vmatprep.subr.bf16.mxu0 %v6112_v13 }
 0x106   : > { %5517 = vmatpush3.bf16.msra.mxu0 %v6112_v13  ;;  %v1938_v13 = vrot.slane %v1936_v3, 5 }
 0x107   : > { %5518 = vmatprep.subr.bf16.mxu0 %v6113_v14 }
 0x10a   : > { %5519 = vmatpush3.bf16.msra.mxu0 %v6113_v14  ;;  %v4920_v14 = vld [vmem:[%s6483_s8 + $0x1c] sm:$0x1] }
 0x10b   : > { %5520 = vmatprep.subr.bf16.mxu0 %v6114_v15 }
 0x10e   : > { %5521 = vmatpush3.bf16.msra.mxu0 %v6114_v15  ;;  %v4922_v15 = vld [vmem:[%s6483_s8 + $0x24] sm:$0x1] }
 0x10f   : > { %5522 = vmatprep.subr.bf16.mxu0 %v6115_v16  ;;  %v1942_v27 = vshll.u32 %v4922_v15, 16  ;;  %v6160_v15 = vld [vmem:[%s6483_s8 + $0xf8] ss:$8 sps:$4 sm:$0xff]  }
 0x110   : > { %5600 = vmatprep.mubr.bf16.mxu1 %v6160_v15 }
 0x112   : > { %5523 = vmatpush3.bf16.msra.mxu0 %v6115_v16  ;;  %v4927_v16 = vld [vmem:[%s6483_s8 + $0x38] sm:$0xf] }
 0x113   : > { %5532 = vmatprep.subr.bf16.mxu0 %v6117_v17  ;;  %v1975_v28 = vshrl.u32 %v4927_v16, 16 }
 0x115   : > { %5525 = vmatmul.mubr.bf16.vlgmr.msra.gmra.mrb[0].mxu0 %v6118_v18  ;;  %v1952_v18 = vrot.slane %v1950_v6, 5  ;;  %v1977_v43 = vrot.slane %v1975_v28, 4  ;;  %v6152_v6 = vld [vmem:[#allocation3 + $0x10] sm:$0xff]  }
 0x116   : > { %5533 = vmatpush3.bf16.msra.mxu0 %v6117_v17  ;;  %5528 = vmatprep.mubr.bf16.mxu0 %v6124_v19  ;;  %v1949_v17 = vrot.slane %v1947_v5, 4  ;;  %v1963_v19 = vrot.slane %v1961_v7, 4  ;;  %v6153_v7 = vld [vmem:[#allocation3 + $0x200] sm:$0xff]  }
 0x117   : > { %5534 = vmatprep.subr.bf16.mxu0 %v6119_v20  ;;  %5608 = vmatprep.subr.bf16.mxu1 %v6152_v6 }
 0x118   : > { %v1953_v33 = vor.u32 %v1952_v18, %v1949_v17  ;;  %5609 = vmatpush3.bf16.msra.mxu1 %v6152_v6  ;;  %v6162_v17 = vld [vmem:[%s6483_s8 + $0x108] ss:$8 sps:$4 sm:$0xff]  }
 0x119   : > { %5601 = vmatmul.mubr.bf16.gmra.mrb[4].mxu1 %v6162_v17  ;;  %v6163_v18 = vld [vmem:[#allocation3 + $0x220] sm:$0xff]  }
 0x11a   : > { %5535 = vmatpush3.bf16.msra.mxu0 %v6119_v20  ;;  %v1966_v20 = vrot.slane %v1964_v8, 5  ;;  %v6154_v8 = vld [vmem:[#allocation3 + $0x18] sm:$0xff]  }
 0x11b   : > { %5536 = vmatprep.subr.bf16.mxu0 %v6120_v21  ;;  %5610 = vmatprep.subr.bf16.mxu1 %v6154_v8 }
 0x11c   : > { %v1967_v35 = vor.u32 %v1966_v20, %v1963_v19  ;;  %5611 = vmatpush3.bf16.msra.mxu1 %v6154_v8  ;;  %v6164_v19 = vld [vmem:[#allocation3 + $0x38] sm:$0xff]   ;;  %v6165_v20 = vld [vmem:[#allocation3 + $0x228] sm:$0xff]  }
 0x11d   : > { %5529 = vmatmul.mubr.bf16.gmra.mrb[4].mxu0 %v6126_v22  ;;  %v4924_v22 = vld [vmem:[%s6483_s8 + $0x2c] sm:$0x1] }
 0x11e   : > { %5537 = vmatpush3.bf16.msra.mxu0 %v6120_v21  ;;  %5548 = vmatprep.mubr.bf16.mxu0 %v6128_v23  ;;  %v4929_v21 = vld [vmem:[%s6483_s8 + $0x40] sm:$0xf]  ;;  %v4926_v23 = vld [vmem:[%s6483_s8 + $0x34] sm:$0x1]  ;;  %v1968_v50 = vrot.slane %v1967_v35, 4  ;;  %s6272_s8 = scalar_lea.vmem %s7136_s16, 1024 }
 0x11f   : > { %5538 = vmatprep.subr.bf16.mxu0 %v6121_v24  ;;  %v1989_v30 = vshrl.u32 %v4929_v21, 16  ;;  %v1992_v31 = vshll.u32 %v4929_v21, 16  ;;  %v1970_v36 = vshll.u32 %v4926_v23, 16  ;;  %v6849_v21 = vld [vmem:[#allocation3 + $0x40] sm:$0xff]   ;;  %v6171_v23 = vld [vmem:[#allocation3 + $0x238] sm:$0xff]   ;;  %p6273_p6 = scmp.ne.s32.totalorder %s7136_s16, %s6272_s8  ;;  %p6280_p3 = scmp.lt.s32.totalorder %s6278_s9, %s6272_s8 }
 0x121   : > { %v1991_v45 = vrot.slane %v1989_v30, 4  ;;  %v1972_v51 = vrot.slane %v1970_v36, 5  ;;  %p6274_p10 = pnand %p6273_p6, %p7212_p9  ;;  %p6281_p4 = por %p6280_p3, %p6279_p2 }
 0x122   : > { %5539 = vmatpush3.bf16.msra.mxu0 %v6121_v24  ;;  %v1925_v24 = vor.u32 %v1924_v11, %v1921_v10  ;;  %v6155_v10 = vld [vmem:[#allocation3 + $0x208] sm:$0xff]   ;;  %v6156_v11 = vld [vmem:[#allocation3 + $0x20] sm:$0xff]  }
 0x123   : > { %5540 = vmatprep.subr.bf16.mxu0 %v6122_v25  ;;  %v1973_v60 = vsel %vm6545_vm2, %v1968_v50, %v1972_v51  ;;  %5612 = vmatprep.subr.bf16.mxu1 %v6156_v11  ;;  %p6275_p12 = pneg %p6274_p10 }
 0x124   : > { %v1926_v38 = vrot.slane %v1925_v24, 4  ;;  %5613 = vmatpush3.bf16.msra.mxu1 %v6156_v11  ;;  %v6855_v24 = vld [vmem:[%s7188_s2] ss:$0 sm:$0xff] }
 0x125   : > { %p6282_p7 = pnand %p6281_p4, %p6275_p12 }
 0x126   : > { %5541 = vmatpush3.bf16.msra.mxu0 %v6122_v25  ;;  %v1928_v25 = vshll.u32 %v4920_v14, 16  ;;  %v6159_v14 = vld [vmem:[#allocation3 + $0x218] sm:$0xff]  }
 0x127   : > { %5542 = vmatprep.subr.bf16.mxu0 %v6123_v26 }
 0x128   : > { %v1930_v39 = vrot.slane %v1928_v25, 5 }
 0x12a   : > { %5543 = vmatpush3.bf16.msra.mxu0 %v6123_v26  ;;  %v1939_v26 = vor.u32 %v1938_v13, %v1935_v12  ;;  %v1931_v53 = vsel %vm6545_vm2, %v1926_v38, %v1930_v39  ;;  %v6157_v12 = vld [vmem:[#allocation3 + $0x210] sm:$0xff]   ;;  %v6158_v13 = vld [vmem:[#allocation3 + $0x28] sm:$0xff]  }
 0x12b   : > { %5544 = vmatprep.subr.bf16.mxu0 %v6125_v29  ;;  %5614 = vmatprep.subr.bf16.mxu1 %v6158_v13 }
 0x12c   : > { %v1940_v40 = vrot.slane %v1939_v26, 4  ;;  %5615 = vmatpush3.bf16.msra.mxu1 %v6158_v13 }
 0x12e   : > { %5545 = vmatpush3.bf16.msra.mxu0 %v6125_v29  ;;  %v1978_v29 = vshll.u32 %v4927_v16, 16  ;;  %v6161_v16 = vld [vmem:[#allocation3 + $0x30] sm:$0xff]  }
 0x12f   : > { %5546 = vmatprep.subr.bf16.mxu0 %v6127_v34  ;;  %5616 = vmatprep.subr.bf16.mxu1 %v6161_v16 }
 0x130   : > { %v1980_v44 = vrot.slane %v1978_v29, 5  ;;  %5617 = vmatpush3.bf16.msra.mxu1 %v6161_v16 }
 0x131   : > { %5618 = vmatprep.subr.bf16.mxu1 %v6164_v19 }
 0x132   : > { %5547 = vmatpush3.bf16.msra.mxu0 %v6127_v34  ;;  %v1956_v34 = vshll.u32 %v4924_v22, 16  ;;  %v1981_v56 = vor.u32 %v1980_v44, %v1977_v43  ;;  %v6169_v22 = vld [vmem:[#allocation3 + $0x230] sm:$0xff]  }
 0x133   : > { %5556 = vmatprep.subr.bf16.mxu0 %v6129_v41 }
 0x134   : > { %v1982_v0 = vrot.slane %v1981_v56, 4  ;;  %5619 = vmatpush3.bf16.msra.mxu1 %v6164_v19 }
 0x135   : > { %5549 = vmatmul.mubr.bf16.vlgmr.msra.gmra.mrb[0].mxu0 %v6130_v46  ;;  %v1994_v46 = vrot.slane %v1992_v31, 5  ;;  %5628 = vmatprep.subr.bf16.mxu1 %v6849_v21 }
 0x136   : > { %5557 = vmatpush3.bf16.msra.mxu0 %v6129_v41  ;;  %5552 = vmatprep.mubr.bf16.mxu0 %v6136_v48  ;;  %v1944_v41 = vrot.slane %v1942_v27, 5  ;;  %v1954_v48 = vrot.slane %v1953_v33, 4 }
 0x137   : > { %5558 = vmatprep.subr.bf16.mxu0 %v6131_v49 }
 0x138   : > { %v1945_v55 = vsel %vm6545_vm2, %v1940_v40, %v1944_v41 }
 0x13a   : > { %5559 = vmatpush3.bf16.msra.mxu0 %v6131_v49  ;;  %v1958_v49 = vrot.slane %v1956_v34, 5 }
 0x13b   : > { %5560 = vmatprep.subr.bf16.mxu0 %v6132_v54 }
 0x13c   : > { %v1959_v59 = vsel %vm6545_vm2, %v1954_v48, %v1958_v49 }
 0x13d   : > { %5553 = vmatmul.mubr.bf16.gmra.mrb[4].mxu0 %v6137_v57  ;;  %v1995_v57 = vor.u32 %v1994_v46, %v1991_v45  ;;  %v4949_v63 = vcombine.low %v1959_v59, %v1973_v60 }
 0x13e   : > { %5561 = vmatpush3.bf16.msra.mxu0 %v6132_v54  ;;  %5572 = vmatprep.mubr.bf16.mxu0 %v4947_v58  ;;  %v1984_v54 = vshll.u32 %v4928_v42, 16  ;;  %v1998_v58 = vshll.u32 %v4930_v52, 16 }
 0x13f   : > { %5562 = vmatprep.subr.bf16.mxu0 %v6133_v61  ;;  %v1996_v1 = vrot.slane %v1995_v57, 4 }
 0x140   : > { %v1986_v62 = vrot.slane %v1984_v54, 5  ;;  %v2000_v2 = vrot.slane %v1998_v58, 5 }
 0x142   : > { %5563 = vmatpush3.bf16.msra.mxu0 %v6133_v61  ;;  %v4948_v61 = vcombine.low %v1931_v53, %v1945_v55  ;;  %v1987_v3 = vsel %vm6545_vm2, %v1982_v0, %v1986_v62 }
 0x143   : > { %5564 = vmatprep.subr.bf16.mxu0 %v6134_v4 }
 0x146   : > { %5565 = vmatpush3.bf16.msra.mxu0 %v6134_v4  ;;  %v2001_v4 = vsel %vm6545_vm2, %v1996_v1, %v2000_v2 }
 0x147   : > { %5566 = vmatprep.subr.bf16.mxu0 %v6135_v9  ;;  %v4950_v5 = vcombine.low %v1987_v3, %v2001_v4 }
 0x14a   : > { %5567 = vmatpush3.bf16.msra.mxu0 %v6135_v9  ;;  %v6343_v9 = vmov 0  }
 0x14b   : > { %5568 = vmatprep.subr.bf16.mxu0 %v6138_v32  ;;  %2185 = vst [vmem:[#allocation2 + $0x18] sm:$0xf] %v6343_v9  ;;  %2186 = vst [vmem:[#allocation2 + $0x1c] sm:$0x1] %v6343_v9 }
 0x14c   : > { %2179 = vst [vmem:[#allocation2] sm:$0xf] %v6343_v9  ;;  %2180 = vst [vmem:[#allocation2 + $0x4] sm:$0x1] %v6343_v9 }
 0x14d   : > { %2181 = vst [vmem:[#allocation2 + $0x8] sm:$0xf] %v6343_v9  ;;  %2182 = vst [vmem:[#allocation2 + $0xc] sm:$0x1] %v6343_v9 }
 0x14e   : > { %5569 = vmatpush3.bf16.msra.mxu0 %v6138_v32  ;;  %2183 = vst [vmem:[#allocation2 + $0x10] sm:$0xf] %v6343_v9  ;;  %2184 = vst [vmem:[#allocation2 + $0x14] sm:$0x1] %v6343_v9 }
 0x14f   : > { %5570 = vmatprep.subr.bf16.mxu0 %v6139_v37  ;;  %2187 = vst [vmem:[#allocation2 + $0x20] sm:$0xf] %v6343_v9  ;;  %2188 = vst [vmem:[#allocation2 + $0x24] sm:$0x1] %v6343_v9 }
 0x150   : > { %2189 = vst [vmem:[#allocation2 + $0x28] sm:$0xf] %v6343_v9  ;;  %2190 = vst [vmem:[#allocation2 + $0x2c] sm:$0x1] %v6343_v9 }
 0x151   : > { %2191 = vst [vmem:[#allocation2 + $0x30] sm:$0xf] %v6343_v9  ;;  %2192 = vst [vmem:[#allocation2 + $0x34] sm:$0x1] %v6343_v9 }
 0x152   : > { %5571 = vmatpush3.bf16.msra.mxu0 %v6139_v37  ;;  %2193 = vst [vmem:[#allocation2 + $0x38] sm:$0xf] %v6343_v9  ;;  %2194 = vst [vmem:[#allocation2 + $0x3c] sm:$0x1] %v6343_v9  ;;  %v2330_v50 = vld [vmem:[#allocation2 + $0x18] sm:$0xf] }
 0x153   : > { %2195 = vst [vmem:[#allocation2 + $0x40] sm:$0xf] %v6343_v9  ;;  %2196 = vst [vmem:[#allocation2 + $0x44] sm:$0x1] %v6343_v9  ;;  %5796 = vmatprep.subr.bf16.mxu0 %v6153_v7  ;;  %v2718_v26 = vld [vmem:[#allocation2] sm:$0xf] }
 0x154   : > { %2197 = vst [vmem:[#allocation2 + $0x48] sm:$0xf] %v6343_v9  ;;  %2198 = vst [vmem:[#allocation2 + $0x4c] sm:$0x1] %v6343_v9  ;;  %v2735_v34 = vshrl.u32 %v2718_v26, 16  ;;  %v2738_v35 = vshll.u32 %v2718_v26, 16 }
 0x155   : > { %5573 = vmatmul.mubr.bf16.vlgmr.msra.gmra.mrb[0].mxu0 %v4948_v61  ;;  %v6861_v40 = vld [vmem:[#allocation2 + $0x4] sm:$0x1]  ;;  %v2333_v51 = vld [vmem:[#allocation2 + $0x1c] sm:$0x1]  ;;  %v2315_v58 = vld [vmem:[#allocation2 + $0x8] sm:$0xf] }
 0x156   : > { %5576 = vmatprep.mubr.bf16.mxu0 %v4949_v63  ;;  %5797 = vmatpush3.bf16.msra.mxu0 %v6153_v7  ;;  %v2744_v43 = vshll.u32 %v6861_v40, 16  ;;  %v6864_v46 = vrot.slane %v2735_v34, 4  ;;  %v6866_v48 = vrot.slane %v2738_v35, 5  ;;  %v2321_v1 = vld [vmem:[#allocation2 + $0xc] sm:$0x1] }
 0x157   : > { %5798 = vmatprep.subr.bf16.mxu0 %v6155_v10  ;;  %v2336_v9 = vld [vmem:[#allocation2 + $0x20] sm:$0xf] }
 0x15a   : > { %5799 = vmatpush3.bf16.msra.mxu0 %v6155_v10 }
 0x15b   : > { %5800 = vmatprep.subr.bf16.mxu0 %v6157_v12 }
 0x15d   : > { %5577 = vmatmul.mubr.bf16.gmra.mrb[4].mxu0 %v4950_v5 }
 0x15e   : > { %5801 = vmatpush3.bf16.msra.mxu0 %v6157_v12 }
 0x15f   : > { %5802 = vmatprep.subr.bf16.mxu0 %v6159_v14 }
 0x162   : > { %5803 = vmatpush3.bf16.msra.mxu0 %v6159_v14  ;;  %v2339_v14 = vld [vmem:[#allocation2 + $0x24] sm:$0x1] }
 0x163   : > { %5804 = vmatprep.subr.bf16.mxu0 %v6163_v18 }
 0x166   : > { %5805 = vmatpush3.bf16.msra.mxu0 %v6163_v18 }
 0x167   : > { %5806 = vmatprep.subr.bf16.mxu0 %v6165_v20 }
 0x16a   : > { %5807 = vmatpush3.bf16.msra.mxu0 %v6165_v20 }
 0x16b   : > { %5808 = vmatprep.subr.bf16.mxu0 %v6169_v22 }
 0x16e   : > { %5809 = vmatpush3.bf16.msra.mxu0 %v6169_v22  ;;  %v2324_v22 = vld [vmem:[#allocation2 + $0x10] sm:$0xf] }
 0x16f   : > { %5810 = vmatprep.subr.bf16.mxu0 %v6171_v23 }
 0x172   : > { %5811 = vmatpush3.bf16.msra.mxu0 %v6171_v23  ;;  %v2327_v23 = vld [vmem:[#allocation2 + $0x14] sm:$0x1] }
 0x228   : > { %v5574_v25 = vpop.f32.mrb[0].mxu0 }
 0x229   : > { %v2165_v27 = vadd.f32 %v5574_v25, %v6855_v24  ;;  %v2117_v28 = vpop.f32.mrb[1].mxu0 }
 0x22a   : > { %v2163_v29 = vadd.f32 %v6855_v24, %v2117_v28  ;;  %v5575_v30 = vpop.f32.mrb[2].mxu0 }
 0x22b   : > { %v2173_v31 = vmax.f32 %v2165_v27, 0.0  ;;  %v2166_v32 = vadd.f32 %v5575_v30, %v6855_v24  ;;  %v2120_v33 = vpop.f32.mrb[3].mxu0 }
 0x22c   : > { %v2171_v36 = vmax.f32 %v2163_v29, 0.0  ;;  %v2164_v37 = vadd.f32 %v6855_v24, %v2120_v33 }
 0x22d   : > { %v5129_v38 = vpack.c.bf16 %v2173_v31, %v2173_v31  ;;  %v2174_v39 = vmax.f32 %v2166_v32, 0.0 }
 0x22e   : > { %v5127_v41 = vpack.c.bf16 %v2171_v36, %v2171_v36  ;;  %v2172_v42 = vmax.f32 %v2164_v37, 0.0 }
 0x22f   : > { %v2248_v44 = vshrl.u32 %v5129_v38, 16  ;;  %v5130_v45 = vpack.c.bf16 %v2174_v39, %v2174_v39  ;;  %v2251_v49 = vshll.u32 %v5129_v38, 16  ;;  %v2354_v39 = vld [vmem:[#allocation2 + $0x38] sm:$0xf] }
 0x230   : > { %v2232_v52 = vshrl.u32 %v5127_v41, 16  ;;  %v2235_v53 = vshll.u32 %v5127_v41, 16  ;;  %v5128_v54 = vpack.c.bf16 %v2172_v42, %v2172_v42  ;;  %v5578_v55 = vpop.f32.mrb[4].mxu0 }
 0x231   : > { %v2250_v56 = vrot.slane %v2248_v44, 7  ;;  %v2256_v59 = vshrl.u32 %v5130_v45, 16  ;;  %v2259_v60 = vshll.u32 %v5130_v45, 16  ;;  %v2169_v61 = vadd.f32 %v5578_v55, %v6855_v24  ;;  %v2133_v62 = vpop.f32.mrb[5].mxu0 }
 0x232   : > { %v2234_v0 = vrot.slane %v2232_v52, 7  ;;  %v2240_v2 = vshrl.u32 %v5128_v54, 16  ;;  %v2243_v3 = vshll.u32 %v5128_v54, 16  ;;  %v2167_v4 = vadd.f32 %v6855_v24, %v2133_v62  ;;  %v5579_v5 = vpop.f32.mrb[6].mxu0  ;;  %v2342_v52 = vld [vmem:[#allocation2 + $0x28] sm:$0xf] }
 0x233   : > { %v2253_v6 = vor.u32 %v2251_v49, %v2250_v56  ;;  %v2254_v7 = vrot.slane %v2250_v56, 4  ;;  %v2258_v8 = vrot.slane %v2256_v59, 7  ;;  %v2177_v10 = vmax.f32 %v2169_v61, 0.0  ;;  %v2136_v11 = vpop.f32.mrb[7].mxu0  ;;  %v2357_v49 = vld [vmem:[#allocation2 + $0x3c] sm:$0x1] }
 0x234   : > { %v2237_v12 = vor.u32 %v2235_v53, %v2234_v0  ;;  %v2238_v13 = vrot.slane %v2234_v0, 4  ;;  %v2242_v15 = vrot.slane %v2240_v2, 7  ;;  %v2175_v16 = vmax.f32 %v2167_v4, 0.0  ;;  %v2345_v53 = vld [vmem:[#allocation2 + $0x2c] sm:$0x1]  ;;  %v6170_v4 = vld [vmem:[#allocation3 + $0x48] sm:$0xff]  }
 0x235   : > { %v2331_v17 = vsel %vm6870_vm7, %v2253_v6, %v2330_v50  ;;  %v2334_v18 = vsel %vm6877_vm8, %v2254_v7, %v2333_v51  ;;  %v2261_v19 = vor.u32 %v2259_v60, %v2258_v8  ;;  %v2262_v20 = vrot.slane %v2258_v8, 4  ;;  %v2360_v6 = vld [vmem:[#allocation2 + $0x40] sm:$0xf]  ;;  %v2363_v7 = vld [vmem:[#allocation2 + $0x44] sm:$0x1] }
 0x236   : > { %2332 = vst [vmem:[#allocation2 + $0x18] sm:$0xf] %v2331_v17  ;;  %2335 = vst [vmem:[#allocation2 + $0x1c] sm:$0x1] %v2334_v18  ;;  %v2316_v25 = vsel %vm6870_vm7, %v2237_v12, %v2315_v58  ;;  %v2322_v26 = vsel %vm6877_vm8, %v2238_v13, %v2321_v1  ;;  %v2245_v27 = vor.u32 %v2243_v3, %v2242_v15  ;;  %v2246_v28 = vrot.slane %v2242_v15, 4 }
 0x237   : > { %2317 = vst [vmem:[#allocation2 + $0x8] sm:$0xf] %v2316_v25  ;;  %2323 = vst [vmem:[#allocation2 + $0xc] sm:$0x1] %v2322_v26  ;;  %v2337_v29 = vsel %vm6870_vm7, %v2261_v19, %v2336_v9  ;;  %v2340_v30 = vsel %vm6877_vm8, %v2262_v20, %v2339_v14  ;;  %v5133_v31 = vpack.c.bf16 %v2177_v10, %v2177_v10  ;;  %v6904_v56 = vrot.slane %v2744_v43, 5 }
 0x238   : > { %v5131_v32 = vpack.c.bf16 %v2175_v16, %v2175_v16  ;;  %2338 = vst [vmem:[#allocation2 + $0x20] sm:$0xf] %v2337_v29  ;;  %2341 = vst [vmem:[#allocation2 + $0x24] sm:$0x1] %v2340_v30  ;;  %v2325_v33 = vsel %vm6870_vm7, %v2245_v27, %v2324_v22  ;;  %v2328_v34 = vsel %vm6877_vm8, %v2246_v28, %v2327_v23  ;;  %v2348_v8 = vld [vmem:[#allocation2 + $0x30] sm:$0xf] }
 0x239   : > { %v2170_v35 = vadd.f32 %v5579_v5, %v6855_v24  ;;  %v2168_v36 = vadd.f32 %v6855_v24, %v2136_v11  ;;  %2326 = vst [vmem:[#allocation2 + $0x10] sm:$0xf] %v2325_v33  ;;  %2329 = vst [vmem:[#allocation2 + $0x14] sm:$0x1] %v2328_v34  ;;  %v2280_v37 = vshrl.u32 %v5133_v31, 16  ;;  %v2283_v45 = vshll.u32 %v5133_v31, 16 }
 0x23a   : > { %v2264_v38 = vshrl.u32 %v5131_v32, 16  ;;  %v2267_v51 = vshll.u32 %v5131_v32, 16  ;;  %v2741_v24 = vor.u32 %v6866_v48, %v6864_v46  ;;  %v2351_v9 = vld [vmem:[#allocation2 + $0x34] sm:$0x1] }
 0x23b   : > { %v2178_v41 = vmax.f32 %v2170_v35, 0.0  ;;  %v2176_v42 = vmax.f32 %v2168_v36, 0.0  ;;  %v2282_v44 = vrot.slane %v2280_v37, 7 }
 0x23c   : > { %v2266_v50 = vrot.slane %v2264_v38, 7  ;;  %v2742_v30 = vrot.slane %v2741_v24, 4 }
 0x23d   : > { %v5134_v54 = vpack.c.bf16 %v2178_v41, %v2178_v41  ;;  %v5132_v55 = vpack.c.bf16 %v2176_v42, %v2176_v42  ;;  %v2285_v58 = vor.u32 %v2283_v45, %v2282_v44  ;;  %v2286_v59 = vrot.slane %v2282_v44, 4  ;;  %v6906_v62 = vld [vmem:[#allocation2 + $0x1c] sm:$0x1]  ;;  %v4329_v11 = vld [vmem:[#allocation2 + $0x18] sm:$0xe] }
 0x23e   : > { %v2269_v60 = vor.u32 %v2267_v51, %v2266_v50  ;;  %v2270_v61 = vrot.slane %v2266_v50, 4  ;;  %v6166_v10 = vld [vmem:[#allocation2] ss:$8 sps:$4 sm:$0xff]   ;;  %v5103_v17 = vrot.slane %v4329_v11, 9  ;;  %v4358_v18 = vrot.slane %v6906_v62, 5 }
 0x23f   : > { %v2288_v0 = vshrl.u32 %v5134_v54, 16  ;;  %v2291_v1 = vshll.u32 %v5134_v54, 16  ;;  %v2272_v2 = vshrl.u32 %v5132_v55, 16  ;;  %v2275_v3 = vshll.u32 %v5132_v55, 16  ;;  %5620 = vmatprep.mubr.bf16.mxu1 %v6166_v10  ;;  %v2720_v26 = vld [vmem:[#allocation2 + $0x8] sm:$0xf] }
 0x240   : > { %v2355_v5 = vsel %vm6870_vm7, %v2285_v58, %v2354_v39  ;;  %v2358_v46 = vsel %vm6877_vm8, %v2286_v59, %v2357_v49  ;;  %v2343_v43 = vsel %vm6870_vm7, %v2269_v60, %v2342_v52  ;;  %v2346_v48 = vsel %vm6877_vm8, %v2270_v61, %v2345_v53  ;;  %v6168_v14 = vld [vmem:[#allocation2 + $0x10] ss:$8 sps:$4 sm:$0xff]   ;;  %v6916_v15 = vld [vmem:[#allocation2 + $0x14] sm:$0x1]  ;;  %v6925_v27 = vld [vmem:[#allocation2 + $0xc] sm:$0x1] }
 0x241   : > { %2356 = vst [vmem:[#allocation2 + $0x38] sm:$0xf] %v2355_v5  ;;  %2359 = vst [vmem:[#allocation2 + $0x3c] sm:$0x1] %v2358_v46  ;;  %v2290_v12 = vrot.slane %v2288_v0, 7  ;;  %v2274_v13 = vrot.slane %v2272_v2, 7  ;;  %5621 = vmatmul.mubr.bf16.vlgmr.msra.gmra.mrb[0].mxu1 %v6168_v14  ;;  %v4359_v39 = vsel %vm6921_vm11, %v5103_v17, %v4358_v18  ;;  %v2747_v5 = vsel %vm6545_vm2, %v2742_v30, %v6904_v56 }
 0x242   : > { %2344 = vst [vmem:[#allocation2 + $0x28] sm:$0xf] %v2343_v43  ;;  %2347 = vst [vmem:[#allocation2 + $0x2c] sm:$0x1] %v2346_v48  ;;  %v4328_v16 = vld [vmem:[#allocation2 + $0x10] sm:$0xe]  ;;  %5629 = vmatpush3.bf16.msra.mxu1 %v6849_v21 }
 0x243   : > { %v2293_v19 = vor.u32 %v2291_v1, %v2290_v12  ;;  %v2294_v20 = vrot.slane %v2290_v12, 4  ;;  %v2277_v22 = vor.u32 %v2275_v3, %v2274_v13  ;;  %v2278_v23 = vrot.slane %v2274_v13, 4  ;;  %v6929_v32 = vld [vmem:[#allocation2 + $0x24] sm:$0x1]  ;;  %5630 = vmatprep.subr.bf16.mxu1 %v6170_v4  ;;  %v4330_v37 = vld [vmem:[#allocation2 + $0x20] sm:$0xe] }
 0x244   : > { %v5102_v28 = vrot.slane %v4328_v16, 9  ;;  %v4354_v29 = vrot.slane %v6916_v15, 5  ;;  %v2749_v31 = vshrl.u32 %v2720_v26, 16  ;;  %v6173_v21 = vld [vmem:[#allocation3 + $0x50] sm:$0xff]   ;;  %v2752_v42 = vshll.u32 %v2720_v26, 16  ;;  %v6175_v54 = vld [vmem:[#allocation3 + $0x58] sm:$0xff]  }
 0x245   : > { %v2361_v33 = vsel %vm6870_vm7, %v2293_v19, %v2360_v6  ;;  %v2364_v34 = vsel %vm6877_vm8, %v2294_v20, %v2363_v7  ;;  %v2349_v35 = vsel %vm6870_vm7, %v2277_v22, %v2348_v8  ;;  %v2352_v36 = vsel %vm6877_vm8, %v2278_v23, %v2351_v9  ;;  %v2722_v49 = vld [vmem:[#allocation2 + $0x10] sm:$0xf]  ;;  %v2724_v2 = vld [vmem:[#allocation2 + $0x18] sm:$0xf]  ;;  %v2726_v6 = vld [vmem:[#allocation2 + $0x20] sm:$0xf] }
 0x246   : > { %2362 = vst [vmem:[#allocation2 + $0x40] sm:$0xf] %v2361_v33  ;;  %2365 = vst [vmem:[#allocation2 + $0x44] sm:$0x1] %v2364_v34  ;;  %v4355_v38 = vsel %vm6921_vm11, %v5102_v28, %v4354_v29  ;;  %v2751_v41 = vrot.slane %v2749_v31, 4  ;;  %v2758_v44 = vshll.u32 %v6925_v27, 16  ;;  %5631 = vmatpush3.bf16.msra.mxu1 %v6170_v4 }
 0x247   : > { %2350 = vst [vmem:[#allocation2 + $0x30] sm:$0xf] %v2349_v35  ;;  %2353 = vst [vmem:[#allocation2 + $0x34] sm:$0x1] %v2352_v36  ;;  %v5110_v57 = vcombine.low %v4355_v38, %v4359_v39  ;;  %v5104_v63 = vrot.slane %v4330_v37, 9  ;;  %v4362_v45 = vrot.slane %v6929_v32, 5  ;;  %5632 = vmatprep.subr.bf16.mxu1 %v6173_v21 }
 0x248   : > { %v2754_v51 = vrot.slane %v2752_v42, 5  ;;  %v2763_v59 = vshrl.u32 %v2722_v49, 16  ;;  %v2760_v60 = vrot.slane %v2758_v44, 5  ;;  %v6176_v1 = vld [vmem:[#allocation3 + $0x60] sm:$0xff]   ;;  %v2766_v48 = vshll.u32 %v2722_v49, 16  ;;  %v6177_v13 = vld [vmem:[#allocation3 + $0x68] sm:$0xff]  }
 0x249   : > { %v6172_v50 = vld [vmem:[#allocation2 + $0x20] ss:$8 sps:$4 sm:$0xff]   ;;  %5812 = vmatprep.mubr.bf16.mxu0 %v5110_v57  ;;  %v6945_v52 = vld [vmem:[#allocation2 + $0x2c] sm:$0x1]  ;;  %v4363_v61 = vsel %vm6921_vm11, %v5104_v63, %v4362_v45  ;;  %v2777_v10 = vshrl.u32 %v2724_v2, 16  ;;  %v2780_v11 = vshll.u32 %v2724_v2, 16 }
 0x24a   : > { %v4331_v53 = vld [vmem:[#allocation2 + $0x28] sm:$0xe]  ;;  %5624 = vmatprep.mubr.bf16.mxu1 %v6172_v50  ;;  %v4366_v24 = vrot.slane %v6945_v52, 5  ;;  %v2755_v58 = vor.u32 %v2754_v51, %v2751_v41  ;;  %5633 = vmatpush3.bf16.msra.mxu1 %v6173_v21  ;;  %v2765_v8 = vrot.slane %v2763_v59, 4  ;;  %v2768_v14 = vrot.slane %v2766_v48, 5  ;;  %v6178_v28 = vld [vmem:[#allocation3 + $0x70] sm:$0xff]  }
 0x24b   : > { %v5105_v55 = vrot.slane %v4331_v53, 9  ;;  %v2728_v3 = vld [vmem:[#allocation2 + $0x28] sm:$0xf]  ;;  %5634 = vmatprep.subr.bf16.mxu1 %v6175_v54  ;;  %v2791_v56 = vshrl.u32 %v2726_v6, 16  ;;  %v2794_v16 = vshll.u32 %v2726_v6, 16  ;;  %v2779_v23 = vrot.slane %v2777_v10, 4 }
 0x24c   : > { %v2756_v46 = vrot.slane %v2755_v58, 4  ;;  %v2805_v12 = vshrl.u32 %v2728_v3, 16  ;;  %v2808_v17 = vshll.u32 %v2728_v3, 16  ;;  %v6957_v22 = vld [vmem:[#allocation2 + $0x14] sm:$0x1]  ;;  %v2782_v26 = vrot.slane %v2780_v11, 5 }
 0x24d   : > { %v4367_v0 = vsel %vm6921_vm11, %v5105_v55, %v4366_v24  ;;  %v2769_v29 = vor.u32 %v2768_v14, %v2765_v8  ;;  %v2793_v30 = vrot.slane %v2791_v56, 4  ;;  %v2796_v31 = vrot.slane %v2794_v16, 5  ;;  %v2732_v33 = vld [vmem:[#allocation2 + $0x38] sm:$0xf]  ;;  %v6959_v34 = vld [vmem:[#allocation2 + $0x1c] sm:$0x1] }
 0x24e   : > { %v6174_v4 = vld [vmem:[#allocation2 + $0x30] ss:$8 sps:$4 sm:$0xff]   ;;  %v5111_v43 = vcombine.low %v4363_v61, %v4367_v0  ;;  %v2761_v7 = vsel %vm6545_vm2, %v2756_v46, %v2760_v60  ;;  %5635 = vmatpush3.bf16.msra.mxu1 %v6175_v54  ;;  %v2807_v18 = vrot.slane %v2805_v12, 4  ;;  %v2810_v19 = vrot.slane %v2808_v17, 5  ;;  %v6961_v35 = vld [vmem:[#allocation2 + $0x2c] sm:$0x1] }
 0x24f   : > { %5625 = vmatmul.mubr.bf16.gmra.mrb[4].mxu1 %v6174_v4  ;;  %v5002_v9 = vcombine.low %v2747_v5, %v2761_v7  ;;  %5636 = vmatprep.subr.bf16.mxu1 %v6176_v1  ;;  %v2730_v20 = vld [vmem:[#allocation2 + $0x30] sm:$0xf]  ;;  %v2772_v37 = vshll.u32 %v6957_v22, 16  ;;  %v2783_v39 = vor.u32 %v2782_v26, %v2779_v23  ;;  %v6964_v41 = vld [vmem:[#allocation2 + $0x24] sm:$0x1]  ;;  %v2833_v42 = vshrl.u32 %v2732_v33, 16 }
 0x250   : > { %5813 = vmatmul.mubr.bf16.vlgmr.msra.gmra.mrb[8].mxu0 %v5111_v43  ;;  %v2819_v36 = vshrl.u32 %v2730_v20, 16  ;;  %v2822_v21 = vshll.u32 %v2730_v20, 16  ;;  %v2811_v38 = vor.u32 %v2810_v19, %v2807_v18  ;;  %v2836_v57 = vshll.u32 %v2732_v33, 16  ;;  %v6179_v44 = vld [vmem:[#allocation3 + $0x78] sm:$0xff]   ;;  %v6180_v61 = vld [vmem:[#allocation3 + $0x80] sm:$0xff]  }
 0x251   : > { %5644 = vmatprep.mubr.bf16.mxu1 %v5002_v9  ;;  %v2770_v63 = vrot.slane %v2769_v29, 4  ;;  %v2786_v45 = vshll.u32 %v6959_v34, 16  ;;  %v2797_v49 = vor.u32 %v2796_v31, %v2793_v30  ;;  %v2814_v50 = vshll.u32 %v6961_v35, 16  ;;  %v6969_v2 = vld [vmem:[#allocation2 + $0x34] sm:$0x1] }
 0x252   : > { %5637 = vmatpush3.bf16.msra.mxu1 %v6176_v1  ;;  %v2821_v51 = vrot.slane %v2819_v36, 4  ;;  %v2824_v53 = vrot.slane %v2822_v21, 5  ;;  %v2800_v54 = vshll.u32 %v6964_v41, 16  ;;  %v2812_v55 = vrot.slane %v2811_v38, 4  ;;  %v6975_v48 = vld [vmem:[#allocation2 + $0x3c] sm:$0x1] }
 0x253   : > { %5638 = vmatprep.subr.bf16.mxu1 %v6177_v13  ;;  %v2774_v24 = vrot.slane %v2772_v37, 5  ;;  %v2784_v58 = vrot.slane %v2783_v39, 4  ;;  %v2835_v59 = vrot.slane %v2833_v42, 4  ;;  %v2838_v60 = vrot.slane %v2836_v57, 5  ;;  %v3000_v9 = vld [vmem:[#allocation2] sm:$0xe] }
 0x254   : > { %v2798_v0 = vrot.slane %v2797_v49, 4  ;;  %v2816_v1 = vrot.slane %v2814_v50, 5  ;;  %v2788_v4 = vrot.slane %v2786_v45, 5  ;;  %v2825_v5 = vor.u32 %v2824_v53, %v2821_v51  ;;  %v3001_v10 = vld [vmem:[#allocation2 + $0x8] sm:$0xe]  ;;  %v6184_v37 = vld [vmem:[#allocation3 + $0xa0] sm:$0xff]  }
 0x255   : > { %v2775_v3 = vsel %vm6545_vm2, %v2770_v63, %v2774_v24  ;;  %v2802_v46 = vrot.slane %v2800_v54, 5  ;;  %v2828_v7 = vshll.u32 %v6969_v2, 16  ;;  %v2839_v8 = vor.u32 %v2838_v60, %v2835_v59  ;;  %v6183_v36 = vld [vmem:[#allocation3 + $0x98] sm:$0xff]   ;;  %v6185_v38 = vld [vmem:[#allocation3 + $0xa8] sm:$0xff]   ;;  %v3002_v39 = vld [vmem:[#allocation2 + $0x10] sm:$0xe] }
 0x256   : > { %5639 = vmatpush3.bf16.msra.mxu1 %v6177_v13  ;;  %v2817_v43 = vsel %vm6545_vm2, %v2812_v55, %v2816_v1  ;;  %v2789_v6 = vsel %vm6545_vm2, %v2784_v58, %v2788_v4  ;;  %v6181_v13 = vld [vmem:[#allocation3 + $0x88] sm:$0xff]   ;;  %v2826_v56 = vrot.slane %v2825_v5, 4  ;;  %v2842_v16 = vshll.u32 %v6975_v48, 16  ;;  %v6186_v57 = vld [vmem:[#allocation3 + $0xb0] sm:$0xff]   ;;  %v3005_v45 = vld [vmem:[#allocation2 + $0x28] sm:$0xe] }
 0x257   : > { %5640 = vmatprep.subr.bf16.mxu1 %v6178_v28  ;;  %v5003_v11 = vcombine.low %v2775_v3, %v2789_v6  ;;  %v2803_v12 = vsel %vm6545_vm2, %v2798_v0, %v2802_v46  ;;  %v5014_v17 = vrot.slane %v3000_v9, 9  ;;  %v3029_v18 = vrot.slane %v6861_v40, 5  ;;  %v3003_v42 = vld [vmem:[#allocation2 + $0x18] sm:$0xe]  ;;  %v3004_v51 = vld [vmem:[#allocation2 + $0x20] sm:$0xe] }
 0x258   : > { %v5004_v14 = vcombine.low %v2803_v12, %v2817_v43  ;;  %v5015_v19 = vrot.slane %v3001_v10, 9  ;;  %v3033_v20 = vrot.slane %v6925_v27, 5  ;;  %v2830_v23 = vrot.slane %v2828_v7, 5  ;;  %v6995_v53 = vld [vmem:[#allocation2 + $0x30] sm:$0xe]  ;;  %v6187_v24 = vld [vmem:[#allocation3 + $0xb8] sm:$0xff]  }
 0x259   : > { %v2840_v26 = vrot.slane %v2839_v8, 4  ;;  %v2844_v30 = vrot.slane %v2842_v16, 5  ;;  %v3030_v31 = vsel %vm6921_vm11, %v5014_v17, %v3029_v18  ;;  %v3037_v63 = vrot.slane %v6957_v22, 5  ;;  %v4048_v0 = vld [vmem:[#allocation2 + $0x18] sm:$0xf]  ;;  %v6188_v8 = vld [vmem:[#allocation3 + $0xc0] sm:$0xff]  }
 0x25a   : > { %5641 = vmatpush3.bf16.msra.mxu1 %v6178_v28  ;;  %v6182_v28 = vld [vmem:[#allocation3 + $0x90] sm:$0xff]   ;;  %v2831_v29 = vsel %vm6545_vm2, %v2826_v56, %v2830_v23  ;;  %v3034_v33 = vsel %vm6921_vm11, %v5015_v19, %v3033_v20  ;;  %v5017_v49 = vrot.slane %v3003_v42, 9  ;;  %v3041_v50 = vrot.slane %v6959_v34, 5  ;;  %v4052_v7 = vld [vmem:[#allocation2 + $0x28] sm:$0xf] }
 0x25b   : > { %5642 = vmatprep.subr.bf16.mxu1 %v6179_v44  ;;  %v2845_v40 = vsel %vm6545_vm2, %v2840_v26, %v2844_v30  ;;  %v5022_v21 = vcombine.low %v3030_v31, %v3034_v33  ;;  %v5019_v54 = vrot.slane %v3005_v45, 9  ;;  %v3049_v55 = vrot.slane %v6961_v35, 5  ;;  %v4050_v5 = vld [vmem:[#allocation2 + $0x20] sm:$0xf]  ;;  %v3007_v19 = vld [vmem:[#allocation2 + $0x38] sm:$0xe] }
 0x25c   : > { %v5005_v27 = vcombine.low %v2831_v29, %v2845_v40  ;;  %v5018_v59 = vrot.slane %v3004_v51, 9  ;;  %v3045_v60 = vrot.slane %v6964_v41, 5  ;;  %v3042_v22 = vsel %vm6921_vm11, %v5017_v49, %v3041_v50  ;;  %v6189_v29 = vld [vmem:[#allocation3 + $0xc8] sm:$0xff]  }
 0x25d   : > { %v5020_v34 = vrot.slane %v6995_v53, 9  ;;  %v3053_v1 = vrot.slane %v6969_v2, 5  ;;  %v4072_v35 = vshll.u32 %v6916_v15, 16  ;;  %v3050_v43 = vsel %vm6921_vm11, %v5019_v54, %v3049_v55  ;;  %v6192_v55 = vld [vmem:[#allocation3 + $0xd8] sm:$0xff]  }
 0x25e   : > { %5643 = vmatpush3.bf16.msra.mxu1 %v6179_v44  ;;  %v5016_v44 = vrot.slane %v3002_v39, 9  ;;  %v4077_v41 = vshrl.u32 %v4048_v0, 16  ;;  %v4080_v6 = vshll.u32 %v4048_v0, 16  ;;  %v3046_v9 = vsel %vm6921_vm11, %v5018_v59, %v3045_v60  ;;  %v6193_v59 = vld [vmem:[#allocation3 + $0xe0] sm:$0xff]   ;;  %v6194_v60 = vld [vmem:[#allocation3 + $0xe8] sm:$0xff]  }
 0x25f   : > { %5652 = vmatprep.subr.bf16.mxu1 %v6180_v61  ;;  %v5024_v56 = vcombine.low %v3046_v9, %v3050_v43  ;;  %v4074_v17 = vrot.slane %v4072_v35, 5  ;;  %v4105_v18 = vshrl.u32 %v4052_v7, 16  ;;  %v3057_v39 = vrot.slane %v6975_v48, 5  ;;  %v6198_v43 = vld [vmem:[#allocation3 + $0x100] sm:$0xff]   ;;  %v7032_v9 = vld [vmem:[#allocation2 + $0xc] sm:$0x1] }
 0x260   : > { %v3038_v58 = vsel %vm6921_vm11, %v5016_v44, %v3037_v63  ;;  %v4079_v12 = vrot.slane %v4077_v41, 4  ;;  %v4082_v15 = vrot.slane %v4080_v6, 5  ;;  %v6190_v44 = vld [vmem:[#allocation3 + $0xd0] sm:$0xff]  }
 0x261   : > { %5645 = vmatmul.mubr.bf16.vlgmr.msra.gmra.mrb[0].mxu1 %v5003_v11  ;;  %v5023_v46 = vcombine.low %v3038_v58, %v3042_v22  ;;  %v4086_v11 = vshll.u32 %v6906_v62, 16  ;;  %v4100_v62 = vshll.u32 %v6929_v32, 16  ;;  %v4107_v33 = vrot.slane %v4105_v18, 4  ;;  %v6191_v58 = vld [vmem:[#allocation2 + $0x8] ss:$8 sps:$4 sm:$0xff]  }
 0x262   : > { %5648 = vmatprep.mubr.bf16.mxu1 %v5004_v14  ;;  %5653 = vmatpush3.bf16.msra.mxu1 %v6180_v61  ;;  %v4046_v61 = vld [vmem:[#allocation2 + $0x10] sm:$0xf]  ;;  %v4094_v14 = vshll.u32 %v4050_v5, 16  ;;  %v4083_v20 = vor.u32 %v4082_v15, %v4079_v12 }
 0x263   : > { %5654 = vmatprep.subr.bf16.mxu1 %v6181_v13  ;;  %v4063_v3 = vshrl.u32 %v4046_v61, 16  ;;  %v4066_v4 = vshll.u32 %v4046_v61, 16  ;;  %v4088_v31 = vrot.slane %v4086_v11, 5  ;;  %v4102_v45 = vrot.slane %v4100_v62, 5  ;;  %v3385_v22 = vld [vmem:[#allocation2 + $0x10] sm:$0xf] }
 0x264   : > { %v4096_v26 = vrot.slane %v4094_v14, 5  ;;  %v4084_v40 = vrot.slane %v4083_v20, 4  ;;  %v3383_v61 = vld [vmem:[#allocation2 + $0x8] sm:$0xf]  ;;  %v3414_v0 = vshrl.u32 %v3385_v22, 16 }
 0x265   : > { %v4065_v10 = vrot.slane %v4063_v3, 4  ;;  %v4068_v2 = vrot.slane %v4066_v4, 5  ;;  %v6196_v3 = vld [vmem:[#allocation3 + $0xf8] sm:$0xff]   ;;  %v3400_v4 = vshrl.u32 %v3383_v61, 16  ;;  %v3403_v35 = vshll.u32 %v3383_v61, 16 }
 0x266   : > { %5655 = vmatpush3.bf16.msra.mxu1 %v6181_v13  ;;  %v4091_v13 = vshrl.u32 %v4050_v5, 16  ;;  %v4089_v42 = vsel %vm6545_vm2, %v4084_v40, %v4088_v31  ;;  %v3416_v5 = vrot.slane %v3414_v0, 4  ;;  %v6199_v15 = vld [vmem:[#allocation2 + $0x28] ss:$8 sps:$4 sm:$0xff]   ;;  %v6201_v20 = vld [vmem:[#allocation2 + $0x38] ss:$8 sps:$4 sm:$0xff]  }
 0x267   : > { %5656 = vmatprep.subr.bf16.mxu1 %v6182_v28  ;;  %v4069_v16 = vor.u32 %v4068_v2, %v4065_v10  ;;  %v3402_v41 = vrot.slane %v3400_v4, 4  ;;  %v3405_v6 = vrot.slane %v3403_v35, 5  ;;  %v6197_v10 = vld [vmem:[#allocation2 + $0x18] ss:$8 sps:$4 sm:$0xff]   ;;  %v6204_v31 = vld [vmem:[#allocation3 + $0x120] sm:$0xff]  }
 0x268   : > { %v4093_v23 = vrot.slane %v4091_v13, 4  ;;  %v6200_v2 = vld [vmem:[#allocation3 + $0x108] sm:$0xff]   ;;  %v3409_v13 = vshll.u32 %v7032_v9, 16  ;;  %v7047_v4 = vld [vmem:[#allocation2 + $0x2c] sm:$0x1] }
 0x269   : > { %5649 = vmatmul.mubr.bf16.gmra.mrb[4].mxu1 %v5005_v27  ;;  %v4070_v30 = vrot.slane %v4069_v16, 4  ;;  %v3406_v11 = vor.u32 %v3405_v6, %v3402_v41  ;;  %v3387_v62 = vld [vmem:[#allocation2 + $0x18] sm:$0xf]  ;;  %v7044_v61 = vld [vmem:[#allocation2 + $0x1c] sm:$0x1] }
 0x26a   : > { %5657 = vmatpush3.bf16.msra.mxu1 %v6182_v28  ;;  %5668 = vmatprep.mubr.bf16.mxu1 %v5022_v21  ;;  %v4108_v28 = vshll.u32 %v4052_v7, 16  ;;  %v4097_v27 = vor.u32 %v4096_v26, %v4093_v23  ;;  %v4114_v21 = vshll.u32 %v6945_v52, 16  ;;  %v3054_v52 = vsel %vm6921_vm11, %v5020_v34, %v3053_v1  ;;  %v6195_v34 = vld [vmem:[#allocation3 + $0xf0] sm:$0xff]   ;;  %v7030_v7 = vld [vmem:[#allocation2 + $0x14] sm:$0x1]  ;;  %v6203_v26 = vld [vmem:[#allocation3 + $0x118] sm:$0xff]  }
 0x26b   : > { %5658 = vmatprep.subr.bf16.mxu1 %v6183_v36  ;;  %v3417_v1 = vshll.u32 %v3385_v22, 16  ;;  %v3423_v12 = vshll.u32 %v7030_v7, 16  ;;  %v3407_v16 = vrot.slane %v3406_v11, 4  ;;  %v3411_v18 = vrot.slane %v3409_v13, 5 }
 0x26c   : > { %v4116_v50 = vrot.slane %v4114_v21, 5  ;;  %v3437_v6 = vshll.u32 %v7044_v61, 16  ;;  %v3465_v11 = vshll.u32 %v7047_v4, 16 }
 0x26d   : > { %v3412_v23 = vsel %vm6545_vm2, %v3407_v16, %v3411_v18  ;;  %v6208_v16 = vld [vmem:[#allocation3 + $0x140] sm:$0xff]  }
 0x26e   : > { %5659 = vmatpush3.bf16.msra.mxu1 %v6183_v36  ;;  %v4110_v36 = vrot.slane %v4108_v28, 5 }
 0x26f   : > { %5660 = vmatprep.subr.bf16.mxu1 %v6184_v37 }
 0x270   : > { %v4111_v32 = vor.u32 %v4110_v36, %v4107_v33 }
 0x272   : > { %5661 = vmatpush3.bf16.msra.mxu1 %v6184_v37  ;;  %v5021_v37 = vrot.slane %v3007_v19, 9  ;;  %v4112_v49 = vrot.slane %v4111_v32, 4 }
 0x273   : > { %5662 = vmatprep.subr.bf16.mxu1 %v6185_v38 }
 0x274   : > { %v3058_v51 = vsel %vm6921_vm11, %v5021_v37, %v3057_v39  ;;  %v4117_v53 = vsel %vm6545_vm2, %v4112_v49, %v4116_v50  ;;  %v3428_v37 = vshrl.u32 %v3387_v62, 16  ;;  %v6205_v39 = vld [vmem:[#allocation3 + $0x128] sm:$0xff]   ;;  %v3397_v49 = vld [vmem:[#allocation2 + $0x40] sm:$0xf] }
 0x275   : > { %v5025_v54 = vcombine.low %v3054_v52, %v3058_v51  ;;  %v6206_v50 = vld [vmem:[#allocation3 + $0x130] sm:$0xff]   ;;  %v3498_v22 = vshrl.u32 %v3397_v49, 16 }
 0x276   : > { %5663 = vmatpush3.bf16.msra.mxu1 %v6185_v38  ;;  %v4075_v38 = vsel %vm6545_vm2, %v4070_v30, %v4074_v17  ;;  %v3425_v17 = vrot.slane %v3423_v12, 5  ;;  %v3393_v30 = vld [vmem:[#allocation2 + $0x30] sm:$0xf]  ;;  %v3430_v51 = vrot.slane %v3428_v37, 4 }
 0x277   : > { %5664 = vmatprep.subr.bf16.mxu1 %v6186_v57  ;;  %v7018_v63 = vcombine.low %v4075_v38, %v4089_v42  ;;  %v3470_v36 = vshrl.u32 %v3393_v30, 16  ;;  %v3473_v21 = vshll.u32 %v3393_v30, 16  ;;  %v3431_v38 = vshll.u32 %v3387_v62, 16  ;;  %v7058_v30 = vld [vmem:[#allocation2 + $0x3c] sm:$0x1] }
 0x279   : > { %v3472_v52 = vrot.slane %v3470_v36, 4 }
 0x27a   : > { %5665 = vmatpush3.bf16.msra.mxu1 %v6186_v57  ;;  %v4098_v57 = vrot.slane %v4097_v27, 4  ;;  %v3391_v27 = vld [vmem:[#allocation2 + $0x28] sm:$0xf] }
 0x27b   : > { %5666 = vmatprep.subr.bf16.mxu1 %v6187_v24  ;;  %v3456_v42 = vshrl.u32 %v3391_v27, 16 }
 0x27c   : > { %v4103_v48 = vsel %vm6545_vm2, %v4098_v57, %v4102_v45  ;;  %v3459_v57 = vshll.u32 %v3391_v27, 16  ;;  %v3475_v45 = vrot.slane %v3473_v21, 5  ;;  %v6209_v21 = vld [vmem:[#allocation3 + $0x148] sm:$0xff]  }
 0x27e   : > { %5667 = vmatpush3.bf16.msra.mxu1 %v6187_v24  ;;  %v7028_v24 = vcombine.low %v4103_v48, %v4117_v53  ;;  %v3433_v48 = vrot.slane %v3431_v38, 5  ;;  %v7040_v53 = vld [vmem:[#allocation2 + $0x24] sm:$0x1]  ;;  %v3476_v0 = vor.u32 %v3475_v45, %v3472_v52  ;;  %v3493_v38 = vshll.u32 %v7058_v30, 16 }
 0x27f   : > { %5676 = vmatprep.subr.bf16.mxu1 %v6188_v8  ;;  %v6210_v45 = vld [vmem:[#allocation3 + $0x150] sm:$0xff]  }
 0x280   : > { %v3477_v12 = vrot.slane %v3476_v0, 4  ;;  %v6214_v0 = vld [vmem:[#allocation3 + $0x170] sm:$0xff]  }
 0x281   : > { %5669 = vmatmul.mubr.bf16.vlgmr.msra.gmra.mrb[0].mxu1 %v5023_v46  ;;  %v3419_v46 = vrot.slane %v3417_v1, 5  ;;  %v3434_v1 = vor.u32 %v3433_v48, %v3430_v51  ;;  %v3495_v51 = vrot.slane %v3493_v38, 5  ;;  %v6228_v38 = vld [vmem:[#allocation3 + $0x1c8] sm:$0xff]  }
 0x282   : > { %5672 = vmatprep.mubr.bf16.mxu1 %v5024_v56  ;;  %5677 = vmatpush3.bf16.msra.mxu1 %v6188_v8  ;;  %v6202_v56 = vld [vmem:[#allocation3 + $0x110] sm:$0xff]  }
 0x283   : > { %5678 = vmatprep.subr.bf16.mxu1 %v6189_v29  ;;  %v3420_v8 = vor.u32 %v3419_v46, %v3416_v5  ;;  %v6207_v46 = vld [vmem:[#allocation3 + $0x138] sm:$0xff]  }
 0x285   : > { %v3421_v14 = vrot.slane %v3420_v8, 4 }
 0x286   : > { %5679 = vmatpush3.bf16.msra.mxu1 %v6189_v29  ;;  %v3389_v29 = vld [vmem:[#allocation2 + $0x20] sm:$0xf] }
 0x287   : > { %5680 = vmatprep.subr.bf16.mxu1 %v6190_v44  ;;  %v3426_v19 = vsel %vm6545_vm2, %v3421_v14, %v3425_v17  ;;  %v3442_v33 = vshrl.u32 %v3389_v29, 16  ;;  %v3445_v40 = vshll.u32 %v3389_v29, 16 }
 0x288   : > { %v5046_v28 = vcombine.low %v3412_v23, %v3426_v19  ;;  %v7052_v19 = vld [vmem:[#allocation2 + $0x44] sm:$0x1] }
 0x289   : > { %5673 = vmatmul.mubr.bf16.gmra.mrb[4].mxu1 %v5025_v54  ;;  %v3444_v32 = vrot.slane %v3442_v33, 4  ;;  %v3458_v54 = vrot.slane %v3456_v42, 4  ;;  %v3507_v33 = vshll.u32 %v7052_v19, 16  ;;  %v3665_v42 = vld [vmem:[#allocation2 + $0x8] sm:$0xe] }
 0x28a   : > { %5681 = vmatpush3.bf16.msra.mxu1 %v6190_v44  ;;  %5692 = vmatprep.mubr.bf16.mxu1 %v6191_v58  ;;  %v3447_v44 = vrot.slane %v3445_v40, 5  ;;  %v3395_v58 = vld [vmem:[#allocation2 + $0x38] sm:$0xf]  ;;  %v3666_v40 = vld [vmem:[#allocation2 + $0x10] sm:$0xe] }
 0x28b   : > { %5682 = vmatprep.subr.bf16.mxu1 %v6192_v55  ;;  %v3484_v35 = vshrl.u32 %v3395_v58, 16  ;;  %v3487_v5 = vshll.u32 %v3395_v58, 16  ;;  %v3509_v52 = vrot.slane %v3507_v33, 5  ;;  %v6220_v33 = vld [vmem:[#allocation3 + $0x198] sm:$0xff]  }
 0x28d   : > { %v3486_v14 = vrot.slane %v3484_v35, 4  ;;  %v6215_v35 = vld [vmem:[#allocation3 + $0x178] sm:$0xff]  }
 0x28e   : > { %5683 = vmatpush3.bf16.msra.mxu1 %v6192_v55  ;;  %v3461_v55 = vrot.slane %v3459_v57, 5  ;;  %v5059_v57 = vrot.slane %v3666_v40, 9  ;;  %v6219_v40 = vld [vmem:[#allocation2 + $0x10] ss:$8 sps:$4 sm:$0xff]  }
 0x28f   : > { %5684 = vmatprep.subr.bf16.mxu1 %v6193_v59 }
 0x292   : > { %5685 = vmatpush3.bf16.msra.mxu1 %v6193_v59  ;;  %v3448_v59 = vor.u32 %v3447_v44, %v3444_v32  ;;  %v3695_v32 = vrot.slane %v7030_v7, 5 }
 0x293   : > { %5686 = vmatprep.subr.bf16.mxu1 %v6194_v60 }
 0x294   : > { %v3449_v8 = vrot.slane %v3448_v59, 4  ;;  %v6211_v59 = vld [vmem:[#allocation3 + $0x158] sm:$0xff]  }
 0x296   : > { %5687 = vmatpush3.bf16.msra.mxu1 %v6194_v60  ;;  %v7042_v60 = vld [vmem:[#allocation2 + $0x34] sm:$0x1] }
 0x297   : > { %5688 = vmatprep.subr.bf16.mxu1 %v6195_v34  ;;  %v3479_v41 = vshll.u32 %v7042_v60, 16 }
 0x299   : > { %v3481_v18 = vrot.slane %v3479_v41, 5  ;;  %v3669_v41 = vld [vmem:[#allocation2 + $0x28] sm:$0xe] }
 0x29a   : > { %5689 = vmatpush3.bf16.msra.mxu1 %v6195_v34  ;;  %v3501_v34 = vshll.u32 %v3397_v49, 16  ;;  %v5058_v49 = vrot.slane %v3665_v42, 9  ;;  %v6230_v42 = vld [vmem:[#allocation3 + $0x1d0] sm:$0xff]  }
 0x29b   : > { %5690 = vmatprep.subr.bf16.mxu1 %v6196_v3  ;;  %v3482_v29 = vsel %vm6545_vm2, %v3477_v12, %v3481_v18  ;;  %v5062_v12 = vrot.slane %v3669_v41, 9 }
 0x29e   : > { %5691 = vmatpush3.bf16.msra.mxu1 %v6196_v3  ;;  %v3451_v3 = vshll.u32 %v7040_v53, 16 }
 0x29f   : > { %5700 = vmatprep.subr.bf16.mxu1 %v6198_v43 }
 0x2a0   : > { %v3453_v13 = vrot.slane %v3451_v3, 5  ;;  %v3670_v3 = vld [vmem:[#allocation2 + $0x30] sm:$0xe] }
 0x2a1   : > { %5693 = vmatmul.mubr.bf16.vlgmr.msra.gmra.mrb[0].mxu1 %v6197_v10  ;;  %v3500_v10 = vrot.slane %v3498_v22, 4 }
 0x2a2   : > { %5696 = vmatprep.mubr.bf16.mxu1 %v6199_v15  ;;  %5701 = vmatpush3.bf16.msra.mxu1 %v6198_v43  ;;  %v3462_v43 = vor.u32 %v3461_v55, %v3458_v54  ;;  %v3435_v15 = vrot.slane %v3434_v1, 4  ;;  %v3454_v23 = vsel %vm6545_vm2, %v3449_v8, %v3453_v13  ;;  %v3696_v54 = vsel %vm6921_vm11, %v5059_v57, %v3695_v32  ;;  %v3668_v1 = vld [vmem:[#allocation2 + $0x20] sm:$0xe]  ;;  %v6231_v32 = vld [vmem:[#allocation3 + $0x1d8] sm:$0xff]  }
 0x2a3   : > { %5702 = vmatprep.subr.bf16.mxu1 %v6200_v2  ;;  %v3711_v8 = vrot.slane %v7042_v60, 5  ;;  %v6229_v57 = vld [vmem:[#allocation2 + $0x40] ss:$8 sps:$4 sm:$0xff]  }
 0x2a4   : > { %v3463_v17 = vrot.slane %v3462_v43, 4  ;;  %v3703_v43 = vrot.slane %v7040_v53, 5  ;;  %v3672_v53 = vld [vmem:[#allocation2 + $0x40] sm:$0xe] }
 0x2a6   : > { %5703 = vmatpush3.bf16.msra.mxu1 %v6200_v2  ;;  %v3503_v2 = vrot.slane %v3501_v34, 5  ;;  %v6213_v34 = vld [vmem:[#allocation3 + $0x168] sm:$0xff]  }
 0x2a7   : > { %5704 = vmatprep.subr.bf16.mxu1 %v6202_v56 }
 0x2a9   : > { %5697 = vmatmul.mubr.bf16.gmra.mrb[4].mxu1 %v6201_v20  ;;  %v3439_v20 = vrot.slane %v3437_v6, 5  ;;  %v5063_v6 = vrot.slane %v3670_v3, 9 }
 0x2aa   : > { %5705 = vmatpush3.bf16.msra.mxu1 %v6202_v56  ;;  %5716 = vmatprep.mubr.bf16.mxu1 %v5046_v28  ;;  %v3489_v56 = vrot.slane %v3487_v5, 5  ;;  %v3467_v28 = vrot.slane %v3465_v11, 5  ;;  %v3667_v5 = vld [vmem:[#allocation2 + $0x18] sm:$0xe]  ;;  %v6216_v11 = vld [vmem:[#allocation3 + $0x180] sm:$0xff]  }
 0x2ab   : > { %5706 = vmatprep.subr.bf16.mxu1 %v6203_v26 }
 0x2ac   : > { %v3490_v62 = vor.u32 %v3489_v56, %v3486_v14  ;;  %v3468_v36 = vsel %vm6545_vm2, %v3463_v17, %v3467_v28  ;;  %v3712_v14 = vsel %vm6921_vm11, %v5063_v6, %v3711_v8  ;;  %v3671_v17 = vld [vmem:[#allocation2 + $0x38] sm:$0xe]  ;;  %v6218_v28 = vld [vmem:[#allocation3 + $0x190] sm:$0xff]  }
 0x2ad   : > { %v5048_v37 = vcombine.low %v3468_v36, %v3482_v29  ;;  %v6224_v36 = vld [vmem:[#allocation3 + $0x1b8] sm:$0xff]  }
 0x2ae   : > { %5707 = vmatpush3.bf16.msra.mxu1 %v6203_v26  ;;  %v3504_v26 = vor.u32 %v3503_v2, %v3500_v10  ;;  %v3491_v44 = vrot.slane %v3490_v62, 4  ;;  %v5060_v10 = vrot.slane %v3667_v5, 9  ;;  %v3699_v2 = vrot.slane %v7044_v61, 5 }
 0x2af   : > { %5708 = vmatprep.subr.bf16.mxu1 %v6204_v31 }
 0x2b0   : > { %v3496_v7 = vsel %vm6545_vm2, %v3491_v44, %v3495_v51  ;;  %v3700_v60 = vsel %vm6921_vm11, %v5060_v10, %v3699_v2  ;;  %v4054_v44 = vld [vmem:[#allocation2 + $0x30] sm:$0xf]  ;;  %v6233_v51 = vld [vmem:[#allocation3 + $0x1e8] sm:$0xff]  }
 0x2b2   : > { %5709 = vmatpush3.bf16.msra.mxu1 %v6204_v31  ;;  %v3440_v31 = vsel %vm6545_vm2, %v3435_v15, %v3439_v20  ;;  %v3707_v15 = vrot.slane %v7047_v4, 5  ;;  %v5065_v4 = vrot.slane %v3672_v53, 9  ;;  %v3719_v20 = vrot.slane %v7052_v19, 5  ;;  %v6221_v19 = vld [vmem:[#allocation3 + $0x1a0] sm:$0xff]   ;;  %v7095_v53 = vld [vmem:[#allocation2 + $0x44] sm:$0x1] }
 0x2b3   : > { %5710 = vmatprep.subr.bf16.mxu1 %v6205_v39  ;;  %v5047_v27 = vcombine.low %v3440_v31, %v3454_v23  ;;  %v5064_v23 = vrot.slane %v3671_v17, 9 }
 0x2b4   : > { %v3708_v61 = vsel %vm6921_vm11, %v5062_v12, %v3707_v15  ;;  %v3720_v29 = vsel %vm6921_vm11, %v5065_v4, %v3719_v20  ;;  %v4156_v4 = vshll.u32 %v7095_v53, 16  ;;  %v4332_v20 = vld [vmem:[#allocation2 + $0x30] sm:$0xe] }
 0x2b5   : > { %v5068_v18 = vcombine.low %v3708_v61, %v3712_v14 }
 0x2b6   : > { %5711 = vmatpush3.bf16.msra.mxu1 %v6205_v39  ;;  %v3505_v39 = vrot.slane %v3504_v26, 4  ;;  %v3715_v26 = vrot.slane %v7058_v30, 5  ;;  %v6222_v30 = vld [vmem:[#allocation3 + $0x1a8] sm:$0xff]  }
 0x2b7   : > { %5712 = vmatprep.subr.bf16.mxu1 %v6206_v50 }
 0x2b8   : > { %v3510_v48 = vsel %vm6545_vm2, %v3505_v39, %v3509_v52  ;;  %v3716_v31 = vsel %vm6921_vm11, %v5064_v23, %v3715_v26  ;;  %v6227_v39 = vld [vmem:[#allocation2 + $0x30] ss:$8 sps:$4 sm:$0xff]  }
 0x2b9   : > { %v5049_v55 = vcombine.low %v3496_v7, %v3510_v48  ;;  %v5069_v62 = vcombine.low %v3716_v31, %v3720_v29  ;;  %v6232_v52 = vld [vmem:[#allocation3 + $0x1e0] sm:$0xff]  }
 0x2ba   : > { %5713 = vmatpush3.bf16.msra.mxu1 %v6206_v50  ;;  %v3691_v50 = vrot.slane %v7032_v9, 5  ;;  %v6212_v9 = vld [vmem:[#allocation3 + $0x160] sm:$0xff]  }
 0x2bb   : > { %5714 = vmatprep.subr.bf16.mxu1 %v6207_v46  ;;  %v6236_v23 = vld [vmem:[#allocation3 + $0x200] sm:$0xff]  }
 0x2bc   : > { %v3692_v58 = vsel %vm6921_vm11, %v5058_v49, %v3691_v50  ;;  %v4119_v49 = vshrl.u32 %v4054_v44, 16  ;;  %v4122_v50 = vshll.u32 %v4054_v44, 16 }
 0x2bd   : > { %v5066_v22 = vcombine.low %v3692_v58, %v3696_v54  ;;  %v4058_v58 = vld [vmem:[#allocation2 + $0x40] sm:$0xf] }
 0x2be   : > { %5715 = vmatpush3.bf16.msra.mxu1 %v6207_v46  ;;  %v5061_v46 = vrot.slane %v3668_v1, 9  ;;  %v4121_v7 = vrot.slane %v4119_v49, 4  ;;  %v4150_v1 = vshll.u32 %v4058_v58, 16 }
 0x2bf   : > { %5724 = vmatprep.subr.bf16.mxu1 %v6208_v16 }
 0x2c0   : > { %v3704_v13 = vsel %vm6921_vm11, %v5061_v46, %v3703_v43  ;;  %v4057_v46 = vld [vmem:[#allocation2 + $0x3c] sm:$0x1]  ;;  %v6235_v43 = vld [vmem:[#allocation3 + $0x1f8] sm:$0xff]   ;;  %v4152_v10 = vrot.slane %v4150_v1, 5  ;;  %v4976_v1 = vld [vmem:[%s7192_s6] ss:$0 sm:$0xff] }
 0x2c1   : > { %5717 = vmatmul.mubr.bf16.vlgmr.msra.gmra.mrb[0].mxu1 %v5047_v27  ;;  %v5067_v56 = vcombine.low %v3700_v60, %v3704_v13  ;;  %v6223_v27 = vld [vmem:[#allocation3 + $0x1b0] sm:$0xff]   ;;  %v4142_v15 = vshll.u32 %v4057_v46, 16  ;;  %v7097_v60 = vld [vmem:[#allocation2 + $0x4c] sm:$0x1] }
 0x2c2   : > { %5720 = vmatprep.mubr.bf16.mxu1 %v5048_v37  ;;  %5725 = vmatpush3.bf16.msra.mxu1 %v6208_v16  ;;  %v6217_v16 = vld [vmem:[#allocation3 + $0x188] sm:$0xff]   ;;  %v6225_v37 = vld [vmem:[#allocation2 + $0x20] ss:$8 sps:$4 sm:$0xff]  }
 0x2c3   : > { %5726 = vmatprep.subr.bf16.mxu1 %v6209_v21 }
 0x2c6   : > { %5727 = vmatpush3.bf16.msra.mxu1 %v6209_v21  ;;  %v6226_v21 = vld [vmem:[#allocation3 + $0x1c0] sm:$0xff]  }
 0x2c7   : > { %5728 = vmatprep.subr.bf16.mxu1 %v6210_v45 }
 0x2c9   : > { %5721 = vmatmul.mubr.bf16.gmra.mrb[4].mxu1 %v5049_v55  ;;  %v4124_v55 = vrot.slane %v4122_v50, 5  ;;  %v6239_v50 = vld [vmem:[#allocation3 + $0x218] sm:$0xff]  }
 0x2ca   : > { %5729 = vmatpush3.bf16.msra.mxu1 %v6210_v45  ;;  %5740 = vmatprep.mubr.bf16.mxu1 %v5066_v22  ;;  %v4056_v45 = vld [vmem:[#allocation2 + $0x38] sm:$0xf]  ;;  %v6234_v22 = vld [vmem:[#allocation3 + $0x1f0] sm:$0xff]  }
 0x2cb   : > { %5730 = vmatprep.subr.bf16.mxu1 %v6211_v59  ;;  %v4133_v48 = vshrl.u32 %v4056_v45, 16  ;;  %v4136_v54 = vshll.u32 %v4056_v45, 16  ;;  %v4125_v5 = vor.u32 %v4124_v55, %v4121_v7  ;;  %v6242_v7 = vld [vmem:[#allocation3 + $0x230] sm:$0xff]   ;;  %v4378_v55 = vrot.slane %v7095_v53, 5 }
 0x2cd   : > { %v4126_v12 = vrot.slane %v4125_v5, 4 }
 0x2ce   : > { %5731 = vmatpush3.bf16.msra.mxu1 %v6211_v59  ;;  %v4060_v59 = vld [vmem:[#allocation2 + $0x48] sm:$0xf] }
 0x2cf   : > { %5732 = vmatprep.subr.bf16.mxu1 %v6212_v9  ;;  %v4161_v3 = vshrl.u32 %v4060_v59, 16 }
 0x2d1   : > { %v4163_v2 = vrot.slane %v4161_v3, 4  ;;  %v4989_v3 = vld [vmem:[%s7190_s4] ss:$0 sm:$0xff] }
 0x2d2   : > { %5733 = vmatpush3.bf16.msra.mxu1 %v6212_v9  ;;  %v4135_v9 = vrot.slane %v4133_v48, 4  ;;  %v4334_v48 = vld [vmem:[#allocation2 + $0x40] sm:$0xe] }
 0x2d3   : > { %5734 = vmatprep.subr.bf16.mxu1 %v6213_v34 }
 0x2d6   : > { %5735 = vmatpush3.bf16.msra.mxu1 %v6213_v34  ;;  %v4055_v34 = vld [vmem:[#allocation2 + $0x34] sm:$0x1] }
 0x2d7   : > { %5736 = vmatprep.subr.bf16.mxu1 %v6214_v0  ;;  %v4128_v41 = vshll.u32 %v4055_v34, 16 }
 0x2d9   : > { %v4130_v13 = vrot.slane %v4128_v41, 5 }
 0x2da   : > { %5737 = vmatpush3.bf16.msra.mxu1 %v6214_v0  ;;  %v4147_v0 = vshrl.u32 %v4058_v58, 16  ;;  %v4382_v58 = vrot.slane %v7097_v60, 5 }
 0x2db   : > { %5738 = vmatprep.subr.bf16.mxu1 %v6215_v35  ;;  %v4131_v17 = vsel %vm6545_vm2, %v4126_v12, %v4130_v13 }
 0x2dc   : > { %v4149_v8 = vrot.slane %v4147_v0, 4 }
 0x2de   : > { %5739 = vmatpush3.bf16.msra.mxu1 %v6215_v35  ;;  %v4164_v35 = vshll.u32 %v4060_v59, 16  ;;  %v5108_v59 = vrot.slane %v4334_v48, 9 }
 0x2df   : > { %5748 = vmatprep.subr.bf16.mxu1 %v6216_v11 }
 0x2e1   : > { %5741 = vmatmul.mubr.bf16.vlgmr.msra.gmra.mrb[0].mxu1 %v5067_v56  ;;  %v4153_v56 = vor.u32 %v4152_v10, %v4149_v8 }
 0x2e2   : > { %5744 = vmatprep.mubr.bf16.mxu1 %v5068_v18  ;;  %5749 = vmatpush3.bf16.msra.mxu1 %v6216_v11  ;;  %v4166_v11 = vrot.slane %v4164_v35, 5  ;;  %v4144_v18 = vrot.slane %v4142_v15, 5  ;;  %v5839_v35 = vadd.f32 %v4989_v3, %v4976_v1 }
 0x2e3   : > { %5750 = vmatprep.subr.bf16.mxu1 %v6217_v16  ;;  %v4154_v31 = vrot.slane %v4153_v56, 4 }
 0x2e4   : > { %v4167_v61 = vor.u32 %v4166_v11, %v4163_v2 }
 0x2e6   : > { %5751 = vmatpush3.bf16.msra.mxu1 %v6217_v16  ;;  %v4170_v16 = vshll.u32 %v7097_v60, 16 }
 0x2e7   : > { %5752 = vmatprep.subr.bf16.mxu1 %v6218_v28 }
 0x2e9   : > { %5745 = vmatmul.mubr.bf16.gmra.mrb[4].mxu1 %v5069_v62  ;;  %v4168_v62 = vrot.slane %v4167_v61, 4 }
 0x2ea   : > { %5753 = vmatpush3.bf16.msra.mxu1 %v6218_v28  ;;  %5764 = vmatprep.mubr.bf16.mxu1 %v6219_v40  ;;  %v4333_v40 = vld [vmem:[#allocation2 + $0x38] sm:$0xe] }
 0x2eb   : > { %5754 = vmatprep.subr.bf16.mxu1 %v6220_v33 }
 0x2ee   : > { %5755 = vmatpush3.bf16.msra.mxu1 %v6220_v33  ;;  %v4172_v33 = vrot.slane %v4170_v16, 5 }
 0x2ef   : > { %5756 = vmatprep.subr.bf16.mxu1 %v6221_v19 }
 0x2f2   : > { %5757 = vmatpush3.bf16.msra.mxu1 %v6221_v19 }
 0x2f3   : > { %5758 = vmatprep.subr.bf16.mxu1 %v6222_v30 }
 0x2f6   : > { %5759 = vmatpush3.bf16.msra.mxu1 %v6222_v30  ;;  %v5106_v30 = vrot.slane %v4332_v20, 9 }
 0x2f7   : > { %5760 = vmatprep.subr.bf16.mxu1 %v6223_v27 }
 0x2fa   : > { %5761 = vmatpush3.bf16.msra.mxu1 %v6223_v27  ;;  %v4370_v27 = vrot.slane %v4055_v34, 5 }
 0x2fb   : > { %5762 = vmatprep.subr.bf16.mxu1 %v6224_v36 }
 0x2fe   : > { %5763 = vmatpush3.bf16.msra.mxu1 %v6224_v36 }
 0x2ff   : > { %5772 = vmatprep.subr.bf16.mxu1 %v6226_v21 }
 0x301   : > { %5765 = vmatmul.mubr.bf16.vlgmr.msra.gmra.mrb[0].mxu1 %v6225_v37 }
 0x302   : > { %5768 = vmatprep.mubr.bf16.mxu1 %v6227_v39  ;;  %5773 = vmatpush3.bf16.msra.mxu1 %v6226_v21  ;;  %v4158_v21 = vrot.slane %v4156_v4, 5  ;;  %v5107_v39 = vrot.slane %v4333_v40, 9 }
 0x303   : > { %5774 = vmatprep.subr.bf16.mxu1 %v6228_v38 }
 0x306   : > { %5775 = vmatpush3.bf16.msra.mxu1 %v6228_v38  ;;  %v6237_v38 = vld [vmem:[#allocation3 + $0x208] sm:$0xff]  }
 0x307   : > { %5776 = vmatprep.subr.bf16.mxu1 %v6230_v42 }
 0x309   : > { %5769 = vmatmul.mubr.bf16.gmra.mrb[4].mxu1 %v6229_v57  ;;  %v4159_v57 = vsel %vm6545_vm2, %v4154_v31, %v4158_v21 }
 0x30a   : > { %5777 = vmatpush3.bf16.msra.mxu1 %v6230_v42  ;;  %5788 = vmatprep.mubr.bf16.mxu1 %v7018_v63  ;;  %v4138_v63 = vrot.slane %v4136_v54, 5  ;;  %v4374_v42 = vrot.slane %v4057_v46, 5  ;;  %v4335_v54 = vld [vmem:[#allocation2 + $0x48] sm:$0xe] }
 0x30b   : > { %5778 = vmatprep.subr.bf16.mxu1 %v6231_v32 }
 0x30c   : > { %v4139_v6 = vor.u32 %v4138_v63, %v4135_v9  ;;  %v4375_v45 = vsel %vm6921_vm11, %v5107_v39, %v4374_v42  ;;  %v6243_v9 = vld [vmem:[#allocation3 + $0x238] sm:$0xff]   ;;  %v4379_v63 = vsel %vm6921_vm11, %v5108_v59, %v4378_v55 }
 0x30e   : > { %5779 = vmatpush3.bf16.msra.mxu1 %v6231_v32  ;;  %v4140_v14 = vrot.slane %v4139_v6, 4  ;;  %v4173_v32 = vsel %vm6545_vm2, %v4168_v62, %v4172_v33 }
 0x30f   : > { %5780 = vmatprep.subr.bf16.mxu1 %v6232_v52  ;;  %v5093_v44 = vcombine.low %v4159_v57, %v4173_v32 }
 0x310   : > { %v4145_v26 = vsel %vm6545_vm2, %v4140_v14, %v4144_v18 }
 0x311   : > { %v5092_v29 = vcombine.low %v4131_v17, %v4145_v26 }
 0x312   : > { %5781 = vmatpush3.bf16.msra.mxu1 %v6232_v52  ;;  %v6238_v52 = vld [vmem:[#allocation3 + $0x210] sm:$0xff]  }
 0x313   : > { %5782 = vmatprep.subr.bf16.mxu1 %v6233_v51 }
 0x316   : > { %5783 = vmatpush3.bf16.msra.mxu1 %v6233_v51  ;;  %v6240_v51 = vld [vmem:[#allocation3 + $0x220] sm:$0xff]  }
 0x317   : > { %5784 = vmatprep.subr.bf16.mxu1 %v6234_v22 }
 0x31a   : > { %5785 = vmatpush3.bf16.msra.mxu1 %v6234_v22  ;;  %v5109_v22 = vrot.slane %v4335_v54, 9 }
 0x31b   : > { %5786 = vmatprep.subr.bf16.mxu1 %v6235_v43 }
 0x31c   : > { %v4383_v34 = vsel %vm6921_vm11, %v5109_v22, %v4382_v58 }
 0x31d   : > { %v5113_v0 = vcombine.low %v4379_v63, %v4383_v34 }
 0x31e   : > { %5787 = vmatpush3.bf16.msra.mxu1 %v6235_v43 }
 0x31f   : > { %5820 = vmatprep.subr.bf16.mxu1 %v6236_v23 }
 0x321   : > { %5789 = vmatmul.mubr.bf16.vlgmr.msra.gmra.mrb[0].mxu1 %v7028_v24  ;;  %v4371_v24 = vsel %vm6921_vm11, %v5106_v30, %v4370_v27 }
 0x322   : > { %5792 = vmatprep.mubr.bf16.mxu1 %v5092_v29  ;;  %5828 = vmatpush3.bf16.msra.mxu1 %v6236_v23  ;;  %v5112_v49 = vcombine.low %v4371_v24, %v4375_v45 }
 0x323   : > { %v7105_v28 = vpop.f32.mrb[8].mxu0  ;;  %5821 = vmatprep.subr.bf16.mxu1 %v6237_v38 }
 0x324   : > { %v7107_v19 = vpop.f32.mrb[9].mxu0 }
 0x325   : > { %v5815_v36 = vpop.f32.mrb[10].mxu0 }
 0x326   : > { %v4502_v37 = vpop.f32.mrb[11].mxu0  ;;  %5829 = vmatpush3.bf16.msra.mxu1 %v6237_v38 }
 0x327   : > { %5822 = vmatprep.subr.bf16.mxu1 %v6238_v52 }
 0x329   : > { %5793 = vmatmul.mubr.bf16.gmra.mrb[4].mxu1 %v5093_v44 }
 0x32a   : > { %5830 = vmatpush3.bf16.msra.mxu1 %v6238_v52  ;;  %5816 = vmatprep.mubr.bf16.mxu1 %v5112_v49 }
 0x32b   : > { %5823 = vmatprep.subr.bf16.mxu1 %v6239_v50 }
 0x32e   : > { %5831 = vmatpush3.bf16.msra.mxu1 %v6239_v50 }
 0x32f   : > { %5824 = vmatprep.subr.bf16.mxu1 %v6240_v51 }
 0x332   : > { %5832 = vmatpush3.bf16.msra.mxu1 %v6240_v51 }
 0x333   : > { %5825 = vmatprep.subr.bf16.mxu1 %v6241_v47 }
 0x336   : > { %5833 = vmatpush3.bf16.msra.mxu1 %v6241_v47 }
 0x337   : > { %5826 = vmatprep.subr.bf16.mxu1 %v6242_v7 }
 0x33a   : > { %5834 = vmatpush3.bf16.msra.mxu1 %v6242_v7 }
 0x33b   : > { %5827 = vmatprep.subr.bf16.mxu1 %v6243_v9 }
 0x33e   : > { %5835 = vmatpush3.bf16.msra.mxu1 %v6243_v9 }
 0x341   : > { %5817 = vmatmul.mubr.bf16.vlgmr.msra.gmra.mrb[4].mxu1 %v5113_v0 }
 0x3f4   : > { %v5790_v5 = vpop.f32.mrb[0].mxu1 }
 0x3f5   : > { %v5837_v46 = vadd.f32 %v5839_v35, %v5790_v5  ;;  %v4289_v43 = vpop.f32.mrb[1].mxu1 }
 0x3f6   : > { %v5840_v25 = vadd.f32 %v5839_v35, %v4289_v43  ;;  %v5791_v41 = vpop.f32.mrb[2].mxu1 }
 0x3f7   : > { %v5838_v6 = vadd.f32 %v5837_v46, %v7105_v28  ;;  %v5843_v8 = vadd.f32 %v5839_v35, %v5791_v41  ;;  %v4292_v10 = vpop.f32.mrb[3].mxu1 }
 0x3f8   : > { %v5841_v2 = vadd.f32 %v5840_v25, %v7107_v19  ;;  %v5846_v11 = vadd.f32 %v5839_v35, %v4292_v10 }
 0x3f9   : > { %v4540_v12 = vmax.f32 %v5838_v6, 0.0  ;;  %v5844_v15 = vadd.f32 %v5843_v8, %v5815_v36 }
 0x3fa   : > { %v4538_v13 = vmax.f32 %v5841_v2, 0.0  ;;  %v5847_v14 = vadd.f32 %v5846_v11, %v4502_v37 }
 0x3fb   : > { %4548 = vst [vmem:[%s289_s20 + $0x10] sm:$0xff] %v4540_v12  ;;  %v4541_v53 = vmax.f32 %v5844_v15, 0.0 }
 0x3fc   : > { %4546 = vst [vmem:[%s289_s20] sm:$0xff] %v4538_v13  ;;  %v4539_v60 = vmax.f32 %v5847_v14, 0.0 }
 0x3fd   : > { %4549 = vst [vmem:[%s289_s20 + $0x18] sm:$0xff] %v4541_v53 }
 0x3fe   : > { %4547 = vst [vmem:[%s289_s20 + $0x8] sm:$0xff] %v4539_v60 }
 0x414   : > { %v5818_v56 = vpop.f32.mrb[4].mxu1 }
 0x415   : > { %v5849_v61 = vadd.f32 %v5839_v35, %v5818_v56  ;;  %v4515_v16 = vpop.f32.mrb[5].mxu1 }
 0x416   : > { %v5851_v17 = vadd.f32 %v5839_v35, %v4515_v16  ;;  %v5819_v18 = vpop.f32.mrb[6].mxu1 }
 0x417   : > { %v4544_v4 = vmax.f32 %v5849_v61, 0.0  ;;  %v5853_v20 = vadd.f32 %v5839_v35, %v5819_v18  ;;  %v4518_v23 = vpop.f32.mrb[7].mxu1 }
 0x418   : > { %v4542_v26 = vmax.f32 %v5851_v17, 0.0  ;;  %v5855_v28 = vadd.f32 %v5839_v35, %v4518_v23 }
 0x419   : > { %4552 = vst [vmem:[%s289_s20 + $0x30] sm:$0xff] %v4544_v4  ;;  %v4545_v29 = vmax.f32 %v5853_v20, 0.0 }
 0x41a   : > { %4550 = vst [vmem:[%s289_s20 + $0x20] sm:$0xff] %v4542_v26  ;;  %v4543_v31 = vmax.f32 %v5855_v28, 0.0 }
 0x41b   : > { %4553 = vst [vmem:[%s289_s20 + $0x38] sm:$0xff] %v4545_v29 }
 0x41c   : > { %4551 = vst [vmem:[%s289_s20 + $0x28] sm:$0xff] %v4543_v31 }
 0x41d   : > { %6285 = shalt.err (!%p6282_p7)
}
 0x41e   : > { %s6286_s14 = scalar_lea.hbm %s7141_s22, 1024  ;;  %s6290_s19 = scalar_lea.hbm %s7193_s7, 2048 }
 0x41f   : > { %p6287_p8 = scmp.ne.s32.totalorder %s7141_s22, %s6286_s14  ;;  %p6291_p1 = scmp.lt.u32.totalorder %s7141_s22, %s7193_s7 }
 0x420   : > { %p6292_p0 = scmp.lt.u32.totalorder %s6290_s19, %s6286_s14  ;;  %p6294_p6 = scmp.lt.u32.totalorder %s6286_s14, %s7141_s22 }
 0x421   : > { %p6288_p11 = pnand %p6287_p8, %p7212_p9 }
 0x422   : > { %p6293_p5 = por %p6292_p0, %p6291_p1 }
 0x423   : > { %p6289_p13 = pneg %p6288_p11 }
 0x424   : > { %p6295_p10 = por %p6294_p6, %p6293_p5 }
 0x426   : > { %p6296_p12 = pnand %p6295_p10, %p6289_p13 }
 0x428   : > { %6299 = shalt.err (!%p6296_p12)
}
 0x429   : > { %s6345_s13 = smov 128   ;;  %s6346_s15 = smov 8  }
 0x42a   : > { %5993 = dma.vmem_to_hbm [thread:$0]  (%p7212_p9), %s7136_s16, 1024, %s7141_s22, %s7145_s28, %s6345_s13, %s6345_s13, %s6346_s15  }
 0x42b PF: > { %p6005_p2 = scmp.ge.s32.totalorder %s6338_s27, 2  ;;  %s4583_s8 = sand.u32 1, %s6326_s24  }
 0x42c   : > { %p7213_p3 = scmp.ne.s32.totalorder %s7198_s12, 0  ;;  %s4584_s23 = scalar_lea.sflag [#allocation5], %s4583_s8 }
 0x42e   : > { %p6000_p4 = pnand %p6005_p2, %p7213_p3 }
 0x430   : > { %6321 = dma.done.wait (!%p6000_p4), %s4584_s23, 1024  }
 0x431   : > { %6323 = vsyncadd (!%p6000_p4), %s4584_s23, 4294966272  ;;  %p18_p7 = scmp.ge.s32.totalorder %s6412_s30, 4   ;;  %s7214_s24 = smov %s6330_s25 }
 0x432   : > { %s7215_s25 = smov %s6334_s26  ;;  %s7216_s26 = smov %s6423_s10 }
 0x433   : > { %s7217_s27 = smov %s6412_s30  ;;  %20 = sbr.rel (!%p18_p7) target bundleno = 4 (0x4), region = 111 }
 0x43a   :  { %4589 = vsyncpa [#allocation4], 1 }
 0x43b   :  { %4591 = vsyncpa [#allocation4 + $0x1], 1 }
 0x43c   :  { %4592 = vsyncpa [#allocation5], 1 }
 0x43d   :  { %4594 = vsyncpa [#allocation5 + $0x1], 1 }

</bundles_post_ra>
